<compile_context>
chip_gen: v7x
topology: tpu7x:2x2x1
jax: 0.10.0
libtpu: 0.0.40
codegen_flags: <defaults>
</compile_context>

<pallas_src>
import functools

import jax
import jax.numpy as jnp
from jax.experimental import pallas as pl
from jax.experimental.pallas import tpu as pltpu

# ----------------------------- model config ---------------------------------
S = 8        # sequence length
D = 32       # model dim (layer.output_size)
H = 4        # attention heads
DK = D // H  # per-head dim
DFF = 64     # FFN hidden dim
N_LAYERS = 2
EPS = 1e-6
NEG_INF = -1e9

PARAM_ORDER = ("wq", "wk", "wv", "bq", "bk", "bv",
               "wo", "bo", "w1", "b1", "w2", "b2", "norms")


# ------------------------------ kernel ---------------------------------------
def encoder_stack_kernel(x_ref, bias_ref,
                         wq_ref, wk_ref, wv_ref, bq_ref, bk_ref, bv_ref,
                         wo_ref, bo_ref, w1_ref, b1_ref, w2_ref, b2_ref,
                         norms_ref, o_ref, *, num_heads):
    s, d = x_ref.shape                    # (S, D) block for this batch element
    num_layers = wq_ref.shape[0]
    bf16 = jnp.bfloat16
    f32 = jnp.float32

    x = x_ref[...]                        # f32 residual stream, stays in vregs
    bias = bias_ref[...]                  # (1, S) f32 additive key-mask bias

    def layer_norm(v, gamma, beta):
        # Annotated-Transformer LayerNorm: gamma*(v-mean)/(std+eps)+beta,
        # torch's unbiased std (divide by D-1).  Divide replaced by an exact
        # EUP reciprocal with gamma folded in (frees the VALU slot).
        mean = jnp.mean(v, axis=-1, keepdims=True)
        centered = v - mean
        var = jnp.sum(centered * centered, axis=-1, keepdims=True) * (1.0 / (d - 1))
        inv = pl.reciprocal(jnp.sqrt(var) + EPS)          # exact (approx=False)
        return centered * (gamma * inv) + beta

    for l in range(num_layers):           # static unroll over fused layers
        # TODO(synk): at production depth, replace this static unroll with an
        # "arbitrary" layer grid axis + per-layer weight BlockSpecs so the
        # stacked weights never have to fit VMEM at once (v7x: 64 MiB).
        nl = norms_ref[l]                 # (6, D): g/b attn, g/b ffn, g/b out
        g_attn, b_attn = nl[0:1, :], nl[1:2, :]
        g_ffn, b_ffn = nl[2:3, :], nl[3:4, :]
        g_out, b_out = nl[4:5, :], nl[5:6, :]

        # ---- self-attention sublayer: x + Wo·Attn(LN(x)) ----
        xn = layer_norm(x, g_attn, b_attn)                      # f32 (S, D)
        xn16 = jnp.broadcast_to(xn.astype(bf16)[None], (num_heads, s, d))

        # per-head projections via head-batched matmuls (no lane slicing);
        # 1/sqrt(dk) is folded into the Q weights/bias offline
        q3 = jnp.einsum("hsd,hde->hse", xn16, wq_ref[l],
                        preferred_element_type=f32) + bq_ref[l]   # (H, S, dk)
        k3 = jnp.einsum("hsd,hde->hse", xn16, wk_ref[l],
                        preferred_element_type=f32) + bk_ref[l]
        v3 = jnp.einsum("hsd,hde->hse", xn16, wv_ref[l],
                        preferred_element_type=f32) + bv_ref[l]

        # scores / softmax kept in f32 (mask margin + v5e-safe elementwise)
        scores = jnp.einsum("hqd,hkd->hqk", q3.astype(bf16), k3.astype(bf16),
                            preferred_element_type=f32) + bias    # (H, S, S)
        m = jnp.max(scores, axis=-1, keepdims=True)
        e = jnp.exp(scores - m)
        # approx reciprocal (EUP): rows do not sum to exactly 1 — OK for inference
        p = e * pl.reciprocal(jnp.sum(e, axis=-1, keepdims=True), approx=True)

        ctx3 = jnp.einsum("hqk,hkd->hqd", p.astype(bf16), v3.astype(bf16),
                          preferred_element_type=f32)             # (H, S, dk)
        attn_h = jnp.einsum("hqd,hde->hqe", ctx3.astype(bf16), wo_ref[l],
                            preferred_element_type=f32)           # (H, S, D)
        x = x + jnp.sum(attn_h, axis=0) + bo_ref[l]

        # ---- feed-forward sublayer: x + FFN(LN(x)) ----
        xn = layer_norm(x, g_ffn, b_ffn)
        hid = jnp.maximum(
            jnp.dot(xn.astype(bf16), w1_ref[l],
                    preferred_element_type=f32) + b1_ref[l], 0.0)
        x = x + jnp.dot(hid.astype(bf16), w2_ref[l],
                        preferred_element_type=f32) + b2_ref[l]

        # ---- Encoder.norms[layer_index] ----
        x = layer_norm(x, g_out, b_out)

    # D=32 -> masked lane store; at production pad D to a multiple of 128.
    o_ref[...] = x.astype(o_ref.dtype)


# ------------------------------ wrappers --------------------------------------
def pack_params(layer_params_list):
    """Stack per-layer params along a leading layer axis, split Q/K/V/Wo into
    per-head slabs (so the kernel never lane-slices), fold 1/sqrt(dk) into Q,
    cast all matmul weights to bf16 (biases / LN params stay f32), and pack the
    six LayerNorm gains/biases per layer into one (6, D) slab."""
    scale = 1.0 / (DK ** 0.5)
    bf16 = jnp.bfloat16

    def to_heads_w(w):   # (D, H*dk) -> (H, D, dk); head h = cols h*dk:(h+1)*dk
        return jnp.transpose(w.reshape(D, H, DK), (1, 0, 2))

    def to_heads_b(b):   # (1, H*dk) -> (H, 1, dk)
        return jnp.transpose(b.reshape(1, H, DK), (1, 0, 2))

    def stack(fn):
        return jnp.stack([fn(p) for p in layer_params_list], axis=0)

    return {
        "wq": stack(lambda p: to_heads_w(p["wq"] * scale).astype(bf16)),  # (L,H,D,dk)
        "wk": stack(lambda p: to_heads_w(p["wk"]).astype(bf16)),
        "wv": stack(lambda p: to_heads_w(p["wv"]).astype(bf16)),
        "bq": stack(lambda p: to_heads_b(p["bq"] * scale)),               # (L,H,1,dk) f32
        "bk": stack(lambda p: to_heads_b(p["bk"])),
        "bv": stack(lambda p: to_heads_b(p["bv"])),
        "wo": stack(lambda p: p["wo"].reshape(H, DK, D).astype(bf16)),    # (L,H,dk,D)
        "bo": stack(lambda p: p["bo"]),                                   # (L,1,D)
        "w1": stack(lambda p: p["w1"].astype(bf16)),                      # (L,D,DFF)
        "b1": stack(lambda p: p["b1"]),                                   # (L,1,DFF)
        "w2": stack(lambda p: p["w2"].astype(bf16)),                      # (L,DFF,D)
        "b2": stack(lambda p: p["b2"]),                                   # (L,1,D)
        "norms": stack(lambda p: jnp.concatenate(
            [p["g_attn"], p["b_attn"], p["g_ffn"], p["b_ffn"],
             p["g_out"], p["b_out"]], axis=0)),                           # (L,6,D)
    }


def encoder_forward(x, mask, packed_params):
    """Encoder.forward: all layers applied inside ONE pallas_call, with a
    batch grid axis marked "parallel" (dual-TC on v7x); mask passes through."""
    B_, S_, D_ = x.shape
    # Additive per-key mask bias precomputed outside the kernel (review item).
    key_bias = jnp.where(mask > 0.0, 0.0, NEG_INF).astype(jnp.float32)   # (B,1,S)

    def full_spec(arr):
        n = arr.ndim
        return pl.BlockSpec(arr.shape, lambda b, _n=n: (0,) * _n)

    in_specs = [
        pl.BlockSpec((None, S_, D_), lambda b: (b, 0, 0)),   # x: per-batch block
        pl.BlockSpec((None, 1, S_), lambda b: (b, 0, 0)),    # key bias per batch
    ] + [full_spec(packed_params[k]) for k in PARAM_ORDER]   # weights: resident

    kernel = functools.partial(encoder_stack_kernel, num_heads=H)
    out = pl.pallas_call(
        kernel,
        grid=(B_,),
        in_specs=in_specs,
        out_specs=pl.BlockSpec((None, S_, D_), lambda b: (b, 0, 0)),
        out_shape=jax.ShapeDtypeStruct((B_, S_, D_), x.dtype),
        compiler_params=pltpu.CompilerParams(
            dimension_semantics=("parallel",)),
    )(x, key_bias, *[packed_params[k] for k in PARAM_ORDER])
    return out, mask


# --------------------------- parameter init -----------------------------------
def init_layer_params(key):
    ks = jax.random.split(key, 8)
    std = 0.02
    f32 = jnp.float32
    return {
        "wq": jax.random.normal(ks[0], (D, D), f32) * std,
        "wk": jax.random.normal(ks[1], (D, D), f32) * std,
        "wv": jax.random.normal(ks[2], (D, D), f32) * std,
        "wo": jax.random.normal(ks[3], (D, D), f32) * std,
        "bq": jnp.zeros((1, D), f32),
        "bk": jnp.zeros((1, D), f32),
        "bv": jnp.zeros((1, D), f32),
        "bo": jnp.zeros((1, D), f32),
        "w1": jax.random.normal(ks[4], (D, DFF), f32) * std,
        "b1": jnp.zeros((1, DFF), f32),
        "w2": jax.random.normal(ks[5], (DFF, D), f32) * std,
        "b2": jnp.zeros((1, D), f32),
        "g_attn": jnp.ones((1, D), f32),
        "b_attn": jnp.zeros((1, D), f32),
        "g_ffn": jnp.ones((1, D), f32),
        "b_ffn": jnp.zeros((1, D), f32),
        "g_out": jnp.ones((1, D), f32),
        "b_out": jnp.zeros((1, D), f32),
    }


# --------------------- pure-JAX reference (for validation) --------------------
def _ref_layer_norm(x, g, b):
    mean = jnp.mean(x, axis=-1, keepdims=True)
    var = jnp.sum((x - mean) ** 2, axis=-1, keepdims=True) / (x.shape[-1] - 1)
    return g * (x - mean) / (jnp.sqrt(var) + EPS) + b


def encoder_reference(x, mask, layer_params_list):
    B_, S_, D_ = x.shape
    scale = 1.0 / (DK ** 0.5)
    for p in layer_params_list:
        xn = _ref_layer_norm(x, p["g_attn"], p["b_attn"])
        q = jnp.einsum("bsd,de->bse", xn, p["wq"]) + p["bq"]
        k = jnp.einsum("bsd,de->bse", xn, p["wk"]) + p["bk"]
        v = jnp.einsum("bsd,de->bse", xn, p["wv"]) + p["bv"]
        q = q.reshape(B_, S_, H, DK).transpose(0, 2, 1, 3)
        k = k.reshape(B_, S_, H, DK).transpose(0, 2, 1, 3)
        v = v.reshape(B_, S_, H, DK).transpose(0, 2, 1, 3)
        scores = jnp.einsum("bhqd,bhkd->bhqk", q, k) * scale
        scores = jnp.where(mask[:, :, None, :] > 0, scores, NEG_INF)
        p_attn = jax.nn.softmax(scores, axis=-1)
        ctx = jnp.einsum("bhqk,bhkd->bhqd", p_attn, v)
        ctx = ctx.transpose(0, 2, 1, 3).reshape(B_, S_, D_)
        x = x + jnp.einsum("bsd,de->bse", ctx, p["wo"]) + p["bo"]
        xn = _ref_layer_norm(x, p["g_ffn"], p["b_ffn"])
        hid = jax.nn.relu(jnp.einsum("bsd,de->bse", xn, p["w1"]) + p["b1"])
        x = x + jnp.einsum("bsd,de->bse", hid, p["w2"]) + p["b2"]
        x = _ref_layer_norm(x, p["g_out"], p["b_out"])
    return x, mask


# ---------------------------------- main ---------------------------------------
if __name__ == "__main__":
    B = 2
    key = jax.random.PRNGKey(0)
    kx, kp = jax.random.split(key)

    x = jax.random.normal(kx, (B, S, D), jnp.float32)
    # mask out the last two positions of the second batch element
    mask = jnp.ones((B, 1, S), jnp.float32)
    mask = mask.at[1, 0, -2:].set(0.0)

    layer_keys = jax.random.split(kp, N_LAYERS)
    layer_params = [init_layer_params(k) for k in layer_keys]
    packed = pack_params(layer_params)

    out_x, out_mask = encoder_forward(x, mask, packed)
    out_x = jax.block_until_ready(out_x)
    out_mask = jax.block_until_ready(out_mask)

    assert out_x.shape == (B, S, D)
    assert out_mask.shape == (B, 1, S)
    assert bool(jnp.all(jnp.isfinite(out_x)))

    # sanity check vs. a pure-JAX f32 reference (loose tolerance covers the
    # bf16 MXU operands, the approx EUP reciprocal in the softmax, and matmul
    # rounding)
    ref_x, _ = encoder_reference(x, mask, layer_params)
    assert bool(jnp.allclose(out_x, ref_x, rtol=5e-2, atol=5e-2))

    print("KERNEL_OK")
</pallas_src>

<mosaic_0001>
module attributes {stable_mosaic.version = 11 : i64} {
  func.func @encoder_stack_kernel(%arg0: i32, %arg1: memref<1x8x32xf32, #tpu.memory_space<vmem>>, %arg2: memref<1x1x8xf32, #tpu.memory_space<vmem>>, %arg3: memref<2x4x32x8xbf16, #tpu.memory_space<vmem>>, %arg4: memref<2x4x32x8xbf16, #tpu.memory_space<vmem>>, %arg5: memref<2x4x32x8xbf16, #tpu.memory_space<vmem>>, %arg6: memref<2x4x1x8xf32, #tpu.memory_space<vmem>>, %arg7: memref<2x4x1x8xf32, #tpu.memory_space<vmem>>, %arg8: memref<2x4x1x8xf32, #tpu.memory_space<vmem>>, %arg9: memref<2x4x8x32xbf16, #tpu.memory_space<vmem>>, %arg10: memref<2x1x32xf32, #tpu.memory_space<vmem>>, %arg11: memref<2x32x64xbf16, #tpu.memory_space<vmem>>, %arg12: memref<2x1x64xf32, #tpu.memory_space<vmem>>, %arg13: memref<2x64x32xbf16, #tpu.memory_space<vmem>>, %arg14: memref<2x1x32xf32, #tpu.memory_space<vmem>>, %arg15: memref<2x6x32xf32, #tpu.memory_space<vmem>>, %arg16: memref<1x8x32xf32, #tpu.memory_space<vmem>>) attributes {dimension_semantics = [#tpu.dimension_semantics<parallel>], iteration_bounds = array<i64: 2>, scalar_prefetch = 0 : i64, scratch_operands = 0 : i64, tpu.core_type = #tpu.core_type<tc>, window_params = [{transform_indices = @transform_0, window_bounds = array<i64: 1, 8, 32>}, {transform_indices = @transform_1, window_bounds = array<i64: 1, 1, 8>}, {pipeline_mode = #tpu.pipeline_mode<synchronous>, transform_indices = @transform_2, window_bounds = array<i64: 2, 4, 32, 8>}, {pipeline_mode = #tpu.pipeline_mode<synchronous>, transform_indices = @transform_3, window_bounds = array<i64: 2, 4, 32, 8>}, {pipeline_mode = #tpu.pipeline_mode<synchronous>, transform_indices = @transform_4, window_bounds = array<i64: 2, 4, 32, 8>}, {pipeline_mode = #tpu.pipeline_mode<synchronous>, transform_indices = @transform_5, window_bounds = array<i64: 2, 4, 1, 8>}, {pipeline_mode = #tpu.pipeline_mode<synchronous>, transform_indices = @transform_6, window_bounds = array<i64: 2, 4, 1, 8>}, {pipeline_mode = #tpu.pipeline_mode<synchronous>, transform_indices = @transform_7, window_bounds = array<i64: 2, 4, 1, 8>}, {pipeline_mode = #tpu.pipeline_mode<synchronous>, transform_indices = @transform_8, window_bounds = array<i64: 2, 4, 8, 32>}, {pipeline_mode = #tpu.pipeline_mode<synchronous>, transform_indices = @transform_9, window_bounds = array<i64: 2, 1, 32>}, {pipeline_mode = #tpu.pipeline_mode<synchronous>, transform_indices = @transform_10, window_bounds = array<i64: 2, 32, 64>}, {pipeline_mode = #tpu.pipeline_mode<synchronous>, transform_indices = @transform_11, window_bounds = array<i64: 2, 1, 64>}, {pipeline_mode = #tpu.pipeline_mode<synchronous>, transform_indices = @transform_12, window_bounds = array<i64: 2, 64, 32>}, {pipeline_mode = #tpu.pipeline_mode<synchronous>, transform_indices = @transform_13, window_bounds = array<i64: 2, 1, 32>}, {pipeline_mode = #tpu.pipeline_mode<synchronous>, transform_indices = @transform_14, window_bounds = array<i64: 2, 6, 32>}, {transform_indices = @transform_15, window_bounds = array<i64: 1, 8, 32>}]} {
    %c0 = arith.constant 0 : index
    %c0_0 = arith.constant 0 : index
    %c0_1 = arith.constant 0 : index
    %0 = vector.load %arg1[%c0, %c0_0, %c0_1] : memref<1x8x32xf32, #tpu.memory_space<vmem>>, vector<1x8x32xf32>
    %1 = vector.shape_cast %0 : vector<1x8x32xf32> to vector<8x32xf32>
    %c0_2 = arith.constant 0 : index
    %c0_3 = arith.constant 0 : index
    %c0_4 = arith.constant 0 : index
    %2 = vector.load %arg2[%c0_2, %c0_3, %c0_4] : memref<1x1x8xf32, #tpu.memory_space<vmem>>, vector<1x1x8xf32>
    %3 = vector.shape_cast %2 : vector<1x1x8xf32> to vector<1x8xf32>
    %c0_5 = arith.constant 0 : index
    %c0_6 = arith.constant 0 : index
    %c0_7 = arith.constant 0 : index
    %4 = vector.load %arg15[%c0_5, %c0_6, %c0_7] : memref<2x6x32xf32, #tpu.memory_space<vmem>>, vector<1x6x32xf32>
    %5 = vector.shape_cast %4 : vector<1x6x32xf32> to vector<6x32xf32>
    %6 = vector.extract_strided_slice %5 {offsets = [0, 0], sizes = [1, 32], strides = [1, 1]} : vector<6x32xf32> to vector<1x32xf32>
    %7 = vector.extract_strided_slice %5 {offsets = [1, 0], sizes = [1, 32], strides = [1, 1]} : vector<6x32xf32> to vector<1x32xf32>
    %8 = vector.extract_strided_slice %5 {offsets = [2, 0], sizes = [1, 32], strides = [1, 1]} : vector<6x32xf32> to vector<1x32xf32>
    %9 = vector.extract_strided_slice %5 {offsets = [3, 0], sizes = [1, 32], strides = [1, 1]} : vector<6x32xf32> to vector<1x32xf32>
    %10 = vector.extract_strided_slice %5 {offsets = [4, 0], sizes = [1, 32], strides = [1, 1]} : vector<6x32xf32> to vector<1x32xf32>
    %11 = vector.extract_strided_slice %5 {offsets = [5, 0], sizes = [1, 32], strides = [1, 1]} : vector<6x32xf32> to vector<1x32xf32>
    %cst = arith.constant dense<0.000000e+00> : vector<8xf32>
    %12 = vector.multi_reduction <add>, %1, %cst [1] : vector<8x32xf32> to vector<8xf32>
    %13 = vector.shape_cast %12 : vector<8xf32> to vector<8x1xf32>
    %cst_8 = arith.constant 3.200000e+01 : f32
    %14 = vector.broadcast %cst_8 : f32 to vector<8x1xf32>
    %15 = arith.divf %13, %14 : vector<8x1xf32>
    %16 = vector.broadcast %15 : vector<8x1xf32> to vector<8x32xf32>
    %17 = arith.subf %1, %16 : vector<8x32xf32>
    %18 = arith.mulf %17, %17 : vector<8x32xf32>
    %cst_9 = arith.constant dense<0.000000e+00> : vector<8xf32>
    %19 = vector.multi_reduction <add>, %18, %cst_9 [1] : vector<8x32xf32> to vector<8xf32>
    %20 = vector.shape_cast %19 : vector<8xf32> to vector<8x1xf32>
    %cst_10 = arith.constant 0.0322580636 : f32
    %21 = vector.broadcast %cst_10 : f32 to vector<8x1xf32>
    %22 = arith.mulf %20, %21 : vector<8x1xf32>
    %23 = math.sqrt %22 : vector<8x1xf32>
    %cst_11 = arith.constant 9.99999997E-7 : f32
    %24 = vector.broadcast %cst_11 : f32 to vector<8x1xf32>
    %25 = arith.addf %23, %24 : vector<8x1xf32>
    %26 = tpu.reciprocal %25 : vector<8x1xf32> -> vector<8x1xf32>
    %27 = vector.broadcast %6 : vector<1x32xf32> to vector<8x32xf32>
    %28 = vector.broadcast %26 : vector<8x1xf32> to vector<8x32xf32>
    %29 = arith.mulf %27, %28 : vector<8x32xf32>
    %30 = arith.mulf %17, %29 : vector<8x32xf32>
    %31 = vector.broadcast %7 : vector<1x32xf32> to vector<8x32xf32>
    %32 = arith.addf %30, %31 : vector<8x32xf32>
    %33 = arith.truncf %32 : vector<8x32xf32> to vector<8x32xbf16>
    %34 = vector.shape_cast %33 : vector<8x32xbf16> to vector<1x8x32xbf16>
    %35 = vector.shape_cast %34 : vector<1x8x32xbf16> to vector<1x8x32xbf16>
    %36 = vector.broadcast %35 : vector<1x8x32xbf16> to vector<4x8x32xbf16>
    %c0_12 = arith.constant 0 : index
    %c0_13 = arith.constant 0 : index
    %c0_14 = arith.constant 0 : index
    %c0_15 = arith.constant 0 : index
    %37 = vector.load %arg3[%c0_12, %c0_13, %c0_14, %c0_15] : memref<2x4x32x8xbf16, #tpu.memory_space<vmem>>, vector<1x4x32x8xbf16>
    %38 = vector.shape_cast %37 : vector<1x4x32x8xbf16> to vector<4x32x8xbf16>
    "tpu.trace_start"() <{level = 10 : i32, message = "hsd,hde->hse"}> : () -> ()
    %cst_16 = arith.constant dense<0.000000e+00> : vector<4x8x8xf32>
    %39 = tpu.matmul %36, %38, %cst_16 {dimension_numbers = #tpu.dot_dimension_numbers<[2], [1], [1], [2], [0, 0, 0, 1, 1, 2], [0], [0]>} : vector<4x8x32xbf16>, vector<4x32x8xbf16>, vector<4x8x8xf32> -> vector<4x8x8xf32>
    "tpu.trace_stop"() : () -> ()
    %c0_17 = arith.constant 0 : index
    %c0_18 = arith.constant 0 : index
    %c0_19 = arith.constant 0 : index
    %c0_20 = arith.constant 0 : index
    %40 = vector.load %arg6[%c0_17, %c0_18, %c0_19, %c0_20] : memref<2x4x1x8xf32, #tpu.memory_space<vmem>>, vector<1x4x1x8xf32>
    %41 = vector.shape_cast %40 : vector<1x4x1x8xf32> to vector<4x1x8xf32>
    %42 = vector.broadcast %41 : vector<4x1x8xf32> to vector<4x8x8xf32>
    %43 = arith.addf %39, %42 : vector<4x8x8xf32>
    %c0_21 = arith.constant 0 : index
    %c0_22 = arith.constant 0 : index
    %c0_23 = arith.constant 0 : index
    %c0_24 = arith.constant 0 : index
    %44 = vector.load %arg4[%c0_21, %c0_22, %c0_23, %c0_24] : memref<2x4x32x8xbf16, #tpu.memory_space<vmem>>, vector<1x4x32x8xbf16>
    %45 = vector.shape_cast %44 : vector<1x4x32x8xbf16> to vector<4x32x8xbf16>
    "tpu.trace_start"() <{level = 10 : i32, message = "hsd,hde->hse"}> : () -> ()
    %cst_25 = arith.constant dense<0.000000e+00> : vector<4x8x8xf32>
    %46 = tpu.matmul %36, %45, %cst_25 {dimension_numbers = #tpu.dot_dimension_numbers<[2], [1], [1], [2], [0, 0, 0, 1, 1, 2], [0], [0]>} : vector<4x8x32xbf16>, vector<4x32x8xbf16>, vector<4x8x8xf32> -> vector<4x8x8xf32>
    "tpu.trace_stop"() : () -> ()
    %c0_26 = arith.constant 0 : index
    %c0_27 = arith.constant 0 : index
    %c0_28 = arith.constant 0 : index
    %c0_29 = arith.constant 0 : index
    %47 = vector.load %arg7[%c0_26, %c0_27, %c0_28, %c0_29] : memref<2x4x1x8xf32, #tpu.memory_space<vmem>>, vector<1x4x1x8xf32>
    %48 = vector.shape_cast %47 : vector<1x4x1x8xf32> to vector<4x1x8xf32>
    %49 = vector.broadcast %48 : vector<4x1x8xf32> to vector<4x8x8xf32>
    %50 = arith.addf %46, %49 : vector<4x8x8xf32>
    %c0_30 = arith.constant 0 : index
    %c0_31 = arith.constant 0 : index
    %c0_32 = arith.constant 0 : index
    %c0_33 = arith.constant 0 : index
    %51 = vector.load %arg5[%c0_30, %c0_31, %c0_32, %c0_33] : memref<2x4x32x8xbf16, #tpu.memory_space<vmem>>, vector<1x4x32x8xbf16>
    %52 = vector.shape_cast %51 : vector<1x4x32x8xbf16> to vector<4x32x8xbf16>
    "tpu.trace_start"() <{level = 10 : i32, message = "hsd,hde->hse"}> : () -> ()
    %cst_34 = arith.constant dense<0.000000e+00> : vector<4x8x8xf32>
    %53 = tpu.matmul %36, %52, %cst_34 {dimension_numbers = #tpu.dot_dimension_numbers<[2], [1], [1], [2], [0, 0, 0, 1, 1, 2], [0], [0]>} : vector<4x8x32xbf16>, vector<4x32x8xbf16>, vector<4x8x8xf32> -> vector<4x8x8xf32>
    "tpu.trace_stop"() : () -> ()
    %c0_35 = arith.constant 0 : index
    %c0_36 = arith.constant 0 : index
    %c0_37 = arith.constant 0 : index
    %c0_38 = arith.constant 0 : index
    %54 = vector.load %arg8[%c0_35, %c0_36, %c0_37, %c0_38] : memref<2x4x1x8xf32, #tpu.memory_space<vmem>>, vector<1x4x1x8xf32>
    %55 = vector.shape_cast %54 : vector<1x4x1x8xf32> to vector<4x1x8xf32>
    %56 = vector.broadcast %55 : vector<4x1x8xf32> to vector<4x8x8xf32>
    %57 = arith.addf %53, %56 : vector<4x8x8xf32>
    %58 = arith.truncf %43 : vector<4x8x8xf32> to vector<4x8x8xbf16>
    %59 = arith.truncf %50 : vector<4x8x8xf32> to vector<4x8x8xbf16>
    "tpu.trace_start"() <{level = 10 : i32, message = "hqd,hkd->hqk"}> : () -> ()
    %cst_39 = arith.constant dense<0.000000e+00> : vector<4x8x8xf32>
    %60 = tpu.matmul %58, %59, %cst_39 {dimension_numbers = #tpu.dot_dimension_numbers<[2], [2], [1], [1], [0, 0, 0, 1, 1, 1], [0], [0]>} : vector<4x8x8xbf16>, vector<4x8x8xbf16>, vector<4x8x8xf32> -> vector<4x8x8xf32>
    "tpu.trace_stop"() : () -> ()
    %61 = vector.shape_cast %3 : vector<1x8xf32> to vector<1x1x8xf32>
    %62 = vector.broadcast %61 : vector<1x1x8xf32> to vector<4x8x8xf32>
    %63 = arith.addf %60, %62 : vector<4x8x8xf32>
    %cst_40 = arith.constant dense<0xFF800000> : vector<4x8xf32>
    %64 = vector.multi_reduction <maximumf>, %63, %cst_40 [2] : vector<4x8x8xf32> to vector<4x8xf32>
    %65 = vector.shape_cast %64 : vector<4x8xf32> to vector<4x8x1xf32>
    %66 = vector.broadcast %65 : vector<4x8x1xf32> to vector<4x8x8xf32>
    %67 = arith.subf %63, %66 : vector<4x8x8xf32>
    %68 = math.exp %67 : vector<4x8x8xf32>
    %cst_41 = arith.constant dense<0.000000e+00> : vector<4x8xf32>
    %69 = vector.multi_reduction <add>, %68, %cst_41 [2] : vector<4x8x8xf32> to vector<4x8xf32>
    %70 = vector.shape_cast %69 : vector<4x8xf32> to vector<4x8x1xf32>
    %71 = tpu.reciprocal %70 {approx = true} : vector<4x8x1xf32> -> vector<4x8x1xf32>
    %72 = vector.broadcast %71 : vector<4x8x1xf32> to vector<4x8x8xf32>
    %73 = arith.mulf %68, %72 : vector<4x8x8xf32>
    %74 = arith.truncf %73 : vector<4x8x8xf32> to vector<4x8x8xbf16>
    %75 = arith.truncf %57 : vector<4x8x8xf32> to vector<4x8x8xbf16>
    "tpu.trace_start"() <{level = 10 : i32, message = "hqk,hkd->hqd"}> : () -> ()
    %cst_42 = arith.constant dense<0.000000e+00> : vector<4x8x8xf32>
    %76 = tpu.matmul %74, %75, %cst_42 {dimension_numbers = #tpu.dot_dimension_numbers<[2], [1], [1], [2], [0, 0, 0, 1, 1, 2], [0], [0]>} : vector<4x8x8xbf16>, vector<4x8x8xbf16>, vector<4x8x8xf32> -> vector<4x8x8xf32>
    "tpu.trace_stop"() : () -> ()
    %77 = arith.truncf %76 : vector<4x8x8xf32> to vector<4x8x8xbf16>
    %c0_43 = arith.constant 0 : index
    %c0_44 = arith.constant 0 : index
    %c0_45 = arith.constant 0 : index
    %c0_46 = arith.constant 0 : index
    %78 = vector.load %arg9[%c0_43, %c0_44, %c0_45, %c0_46] : memref<2x4x8x32xbf16, #tpu.memory_space<vmem>>, vector<1x4x8x32xbf16>
    %79 = vector.shape_cast %78 : vector<1x4x8x32xbf16> to vector<4x8x32xbf16>
    "tpu.trace_start"() <{level = 10 : i32, message = "hqd,hde->hqe"}> : () -> ()
    %cst_47 = arith.constant dense<0.000000e+00> : vector<4x8x32xf32>
    %80 = tpu.matmul %77, %79, %cst_47 {dimension_numbers = #tpu.dot_dimension_numbers<[2], [1], [1], [2], [0, 0, 0, 1, 1, 2], [0], [0]>} : vector<4x8x8xbf16>, vector<4x8x32xbf16>, vector<4x8x32xf32> -> vector<4x8x32xf32>
    "tpu.trace_stop"() : () -> ()
    %cst_48 = arith.constant dense<0.000000e+00> : vector<8x32xf32>
    %81 = vector.multi_reduction <add>, %80, %cst_48 [0] : vector<4x8x32xf32> to vector<8x32xf32>
    %82 = arith.addf %1, %81 : vector<8x32xf32>
    %c0_49 = arith.constant 0 : index
    %c0_50 = arith.constant 0 : index
    %c0_51 = arith.constant 0 : index
    %83 = vector.load %arg10[%c0_49, %c0_50, %c0_51] : memref<2x1x32xf32, #tpu.memory_space<vmem>>, vector<1x1x32xf32>
    %84 = vector.shape_cast %83 : vector<1x1x32xf32> to vector<1x32xf32>
    %85 = vector.broadcast %84 : vector<1x32xf32> to vector<8x32xf32>
    %86 = arith.addf %82, %85 : vector<8x32xf32>
    %cst_52 = arith.constant dense<0.000000e+00> : vector<8xf32>
    %87 = vector.multi_reduction <add>, %86, %cst_52 [1] : vector<8x32xf32> to vector<8xf32>
    %88 = vector.shape_cast %87 : vector<8xf32> to vector<8x1xf32>
    %cst_53 = arith.constant 3.200000e+01 : f32
    %89 = vector.broadcast %cst_53 : f32 to vector<8x1xf32>
    %90 = arith.divf %88, %89 : vector<8x1xf32>
    %91 = vector.broadcast %90 : vector<8x1xf32> to vector<8x32xf32>
    %92 = arith.subf %86, %91 : vector<8x32xf32>
    %93 = arith.mulf %92, %92 : vector<8x32xf32>
    %cst_54 = arith.constant dense<0.000000e+00> : vector<8xf32>
    %94 = vector.multi_reduction <add>, %93, %cst_54 [1] : vector<8x32xf32> to vector<8xf32>
    %95 = vector.shape_cast %94 : vector<8xf32> to vector<8x1xf32>
    %cst_55 = arith.constant 0.0322580636 : f32
    %96 = vector.broadcast %cst_55 : f32 to vector<8x1xf32>
    %97 = arith.mulf %95, %96 : vector<8x1xf32>
    %98 = math.sqrt %97 : vector<8x1xf32>
    %cst_56 = arith.constant 9.99999997E-7 : f32
    %99 = vector.broadcast %cst_56 : f32 to vector<8x1xf32>
    %100 = arith.addf %98, %99 : vector<8x1xf32>
    %101 = tpu.reciprocal %100 : vector<8x1xf32> -> vector<8x1xf32>
    %102 = vector.broadcast %8 : vector<1x32xf32> to vector<8x32xf32>
    %103 = vector.broadcast %101 : vector<8x1xf32> to vector<8x32xf32>
    %104 = arith.mulf %102, %103 : vector<8x32xf32>
    %105 = arith.mulf %92, %104 : vector<8x32xf32>
    %106 = vector.broadcast %9 : vector<1x32xf32> to vector<8x32xf32>
    %107 = arith.addf %105, %106 : vector<8x32xf32>
    %108 = arith.truncf %107 : vector<8x32xf32> to vector<8x32xbf16>
    %c0_57 = arith.constant 0 : index
    %c0_58 = arith.constant 0 : index
    %c0_59 = arith.constant 0 : index
    %109 = vector.load %arg11[%c0_57, %c0_58, %c0_59] : memref<2x32x64xbf16, #tpu.memory_space<vmem>>, vector<1x32x64xbf16>
    %110 = vector.shape_cast %109 : vector<1x32x64xbf16> to vector<32x64xbf16>
    %cst_60 = arith.constant dense<0.000000e+00> : vector<8x64xf32>
    %111 = tpu.matmul %108, %110, %cst_60 {dimension_numbers = #tpu.dot_dimension_numbers<[1], [0], [0], [1], [0, 0, 1, 1], [], []>} : vector<8x32xbf16>, vector<32x64xbf16>, vector<8x64xf32> -> vector<8x64xf32>
    %c0_61 = arith.constant 0 : index
    %c0_62 = arith.constant 0 : index
    %c0_63 = arith.constant 0 : index
    %112 = vector.load %arg12[%c0_61, %c0_62, %c0_63] : memref<2x1x64xf32, #tpu.memory_space<vmem>>, vector<1x1x64xf32>
    %113 = vector.shape_cast %112 : vector<1x1x64xf32> to vector<1x64xf32>
    %114 = vector.broadcast %113 : vector<1x64xf32> to vector<8x64xf32>
    %115 = arith.addf %111, %114 : vector<8x64xf32>
    %cst_64 = arith.constant 0.000000e+00 : f32
    %116 = vector.broadcast %cst_64 : f32 to vector<8x64xf32>
    %117 = arith.maximumf %115, %116 : vector<8x64xf32>
    %118 = arith.truncf %117 : vector<8x64xf32> to vector<8x64xbf16>
    %c0_65 = arith.constant 0 : index
    %c0_66 = arith.constant 0 : index
    %c0_67 = arith.constant 0 : index
    %119 = vector.load %arg13[%c0_65, %c0_66, %c0_67] : memref<2x64x32xbf16, #tpu.memory_space<vmem>>, vector<1x64x32xbf16>
    %120 = vector.shape_cast %119 : vector<1x64x32xbf16> to vector<64x32xbf16>
    %cst_68 = arith.constant dense<0.000000e+00> : vector<8x32xf32>
    %121 = tpu.matmul %118, %120, %cst_68 {dimension_numbers = #tpu.dot_dimension_numbers<[1], [0], [0], [1], [0, 0, 1, 1], [], []>} : vector<8x64xbf16>, vector<64x32xbf16>, vector<8x32xf32> -> vector<8x32xf32>
    %122 = arith.addf %86, %121 : vector<8x32xf32>
    %c0_69 = arith.constant 0 : index
    %c0_70 = arith.constant 0 : index
    %c0_71 = arith.constant 0 : index
    %123 = vector.load %arg14[%c0_69, %c0_70, %c0_71] : memref<2x1x32xf32, #tpu.memory_space<vmem>>, vector<1x1x32xf32>
    %124 = vector.shape_cast %123 : vector<1x1x32xf32> to vector<1x32xf32>
    %125 = vector.broadcast %124 : vector<1x32xf32> to vector<8x32xf32>
    %126 = arith.addf %122, %125 : vector<8x32xf32>
    %cst_72 = arith.constant dense<0.000000e+00> : vector<8xf32>
    %127 = vector.multi_reduction <add>, %126, %cst_72 [1] : vector<8x32xf32> to vector<8xf32>
    %128 = vector.shape_cast %127 : vector<8xf32> to vector<8x1xf32>
    %cst_73 = arith.constant 3.200000e+01 : f32
    %129 = vector.broadcast %cst_73 : f32 to vector<8x1xf32>
    %130 = arith.divf %128, %129 : vector<8x1xf32>
    %131 = vector.broadcast %130 : vector<8x1xf32> to vector<8x32xf32>
    %132 = arith.subf %126, %131 : vector<8x32xf32>
    %133 = arith.mulf %132, %132 : vector<8x32xf32>
    %cst_74 = arith.constant dense<0.000000e+00> : vector<8xf32>
    %134 = vector.multi_reduction <add>, %133, %cst_74 [1] : vector<8x32xf32> to vector<8xf32>
    %135 = vector.shape_cast %134 : vector<8xf32> to vector<8x1xf32>
    %cst_75 = arith.constant 0.0322580636 : f32
    %136 = vector.broadcast %cst_75 : f32 to vector<8x1xf32>
    %137 = arith.mulf %135, %136 : vector<8x1xf32>
    %138 = math.sqrt %137 : vector<8x1xf32>
    %cst_76 = arith.constant 9.99999997E-7 : f32
    %139 = vector.broadcast %cst_76 : f32 to vector<8x1xf32>
    %140 = arith.addf %138, %139 : vector<8x1xf32>
    %141 = tpu.reciprocal %140 : vector<8x1xf32> -> vector<8x1xf32>
    %142 = vector.broadcast %10 : vector<1x32xf32> to vector<8x32xf32>
    %143 = vector.broadcast %141 : vector<8x1xf32> to vector<8x32xf32>
    %144 = arith.mulf %142, %143 : vector<8x32xf32>
    %145 = arith.mulf %132, %144 : vector<8x32xf32>
    %146 = vector.broadcast %11 : vector<1x32xf32> to vector<8x32xf32>
    %147 = arith.addf %145, %146 : vector<8x32xf32>
    %c1 = arith.constant 1 : index
    %c0_77 = arith.constant 0 : index
    %c0_78 = arith.constant 0 : index
    %148 = vector.load %arg15[%c1, %c0_77, %c0_78] : memref<2x6x32xf32, #tpu.memory_space<vmem>>, vector<1x6x32xf32>
    %149 = vector.shape_cast %148 : vector<1x6x32xf32> to vector<6x32xf32>
    %150 = vector.extract_strided_slice %149 {offsets = [0, 0], sizes = [1, 32], strides = [1, 1]} : vector<6x32xf32> to vector<1x32xf32>
    %151 = vector.extract_strided_slice %149 {offsets = [1, 0], sizes = [1, 32], strides = [1, 1]} : vector<6x32xf32> to vector<1x32xf32>
    %152 = vector.extract_strided_slice %149 {offsets = [2, 0], sizes = [1, 32], strides = [1, 1]} : vector<6x32xf32> to vector<1x32xf32>
    %153 = vector.extract_strided_slice %149 {offsets = [3, 0], sizes = [1, 32], strides = [1, 1]} : vector<6x32xf32> to vector<1x32xf32>
    %154 = vector.extract_strided_slice %149 {offsets = [4, 0], sizes = [1, 32], strides = [1, 1]} : vector<6x32xf32> to vector<1x32xf32>
    %155 = vector.extract_strided_slice %149 {offsets = [5, 0], sizes = [1, 32], strides = [1, 1]} : vector<6x32xf32> to vector<1x32xf32>
    %cst_79 = arith.constant dense<0.000000e+00> : vector<8xf32>
    %156 = vector.multi_reduction <add>, %147, %cst_79 [1] : vector<8x32xf32> to vector<8xf32>
    %157 = vector.shape_cast %156 : vector<8xf32> to vector<8x1xf32>
    %cst_80 = arith.constant 3.200000e+01 : f32
    %158 = vector.broadcast %cst_80 : f32 to vector<8x1xf32>
    %159 = arith.divf %157, %158 : vector<8x1xf32>
    %160 = vector.broadcast %159 : vector<8x1xf32> to vector<8x32xf32>
    %161 = arith.subf %147, %160 : vector<8x32xf32>
    %162 = arith.mulf %161, %161 : vector<8x32xf32>
    %cst_81 = arith.constant dense<0.000000e+00> : vector<8xf32>
    %163 = vector.multi_reduction <add>, %162, %cst_81 [1] : vector<8x32xf32> to vector<8xf32>
    %164 = vector.shape_cast %163 : vector<8xf32> to vector<8x1xf32>
    %cst_82 = arith.constant 0.0322580636 : f32
    %165 = vector.broadcast %cst_82 : f32 to vector<8x1xf32>
    %166 = arith.mulf %164, %165 : vector<8x1xf32>
    %167 = math.sqrt %166 : vector<8x1xf32>
    %cst_83 = arith.constant 9.99999997E-7 : f32
    %168 = vector.broadcast %cst_83 : f32 to vector<8x1xf32>
    %169 = arith.addf %167, %168 : vector<8x1xf32>
    %170 = tpu.reciprocal %169 : vector<8x1xf32> -> vector<8x1xf32>
    %171 = vector.broadcast %150 : vector<1x32xf32> to vector<8x32xf32>
    %172 = vector.broadcast %170 : vector<8x1xf32> to vector<8x32xf32>
    %173 = arith.mulf %171, %172 : vector<8x32xf32>
    %174 = arith.mulf %161, %173 : vector<8x32xf32>
    %175 = vector.broadcast %151 : vector<1x32xf32> to vector<8x32xf32>
    %176 = arith.addf %174, %175 : vector<8x32xf32>
    %177 = arith.truncf %176 : vector<8x32xf32> to vector<8x32xbf16>
    %178 = vector.shape_cast %177 : vector<8x32xbf16> to vector<1x8x32xbf16>
    %179 = vector.shape_cast %178 : vector<1x8x32xbf16> to vector<1x8x32xbf16>
    %180 = vector.broadcast %179 : vector<1x8x32xbf16> to vector<4x8x32xbf16>
    %c1_84 = arith.constant 1 : index
    %c0_85 = arith.constant 0 : index
    %c0_86 = arith.constant 0 : index
    %c0_87 = arith.constant 0 : index
    %181 = vector.load %arg3[%c1_84, %c0_85, %c0_86, %c0_87] : memref<2x4x32x8xbf16, #tpu.memory_space<vmem>>, vector<1x4x32x8xbf16>
    %182 = vector.shape_cast %181 : vector<1x4x32x8xbf16> to vector<4x32x8xbf16>
    "tpu.trace_start"() <{level = 10 : i32, message = "hsd,hde->hse"}> : () -> ()
    %cst_88 = arith.constant dense<0.000000e+00> : vector<4x8x8xf32>
    %183 = tpu.matmul %180, %182, %cst_88 {dimension_numbers = #tpu.dot_dimension_numbers<[2], [1], [1], [2], [0, 0, 0, 1, 1, 2], [0], [0]>} : vector<4x8x32xbf16>, vector<4x32x8xbf16>, vector<4x8x8xf32> -> vector<4x8x8xf32>
    "tpu.trace_stop"() : () -> ()
    %c1_89 = arith.constant 1 : index
    %c0_90 = arith.constant 0 : index
    %c0_91 = arith.constant 0 : index
    %c0_92 = arith.constant 0 : index
    %184 = vector.load %arg6[%c1_89, %c0_90, %c0_91, %c0_92] : memref<2x4x1x8xf32, #tpu.memory_space<vmem>>, vector<1x4x1x8xf32>
    %185 = vector.shape_cast %184 : vector<1x4x1x8xf32> to vector<4x1x8xf32>
    %186 = vector.broadcast %185 : vector<4x1x8xf32> to vector<4x8x8xf32>
    %187 = arith.addf %183, %186 : vector<4x8x8xf32>
    %c1_93 = arith.constant 1 : index
    %c0_94 = arith.constant 0 : index
    %c0_95 = arith.constant 0 : index
    %c0_96 = arith.constant 0 : index
    %188 = vector.load %arg4[%c1_93, %c0_94, %c0_95, %c0_96] : memref<2x4x32x8xbf16, #tpu.memory_space<vmem>>, vector<1x4x32x8xbf16>
    %189 = vector.shape_cast %188 : vector<1x4x32x8xbf16> to vector<4x32x8xbf16>
    "tpu.trace_start"() <{level = 10 : i32, message = "hsd,hde->hse"}> : () -> ()
    %cst_97 = arith.constant dense<0.000000e+00> : vector<4x8x8xf32>
    %190 = tpu.matmul %180, %189, %cst_97 {dimension_numbers = #tpu.dot_dimension_numbers<[2], [1], [1], [2], [0, 0, 0, 1, 1, 2], [0], [0]>} : vector<4x8x32xbf16>, vector<4x32x8xbf16>, vector<4x8x8xf32> -> vector<4x8x8xf32>
    "tpu.trace_stop"() : () -> ()
    %c1_98 = arith.constant 1 : index
    %c0_99 = arith.constant 0 : index
    %c0_100 = arith.constant 0 : index
    %c0_101 = arith.constant 0 : index
    %191 = vector.load %arg7[%c1_98, %c0_99, %c0_100, %c0_101] : memref<2x4x1x8xf32, #tpu.memory_space<vmem>>, vector<1x4x1x8xf32>
    %192 = vector.shape_cast %191 : vector<1x4x1x8xf32> to vector<4x1x8xf32>
    %193 = vector.broadcast %192 : vector<4x1x8xf32> to vector<4x8x8xf32>
    %194 = arith.addf %190, %193 : vector<4x8x8xf32>
    %c1_102 = arith.constant 1 : index
    %c0_103 = arith.constant 0 : index
    %c0_104 = arith.constant 0 : index
    %c0_105 = arith.constant 0 : index
    %195 = vector.load %arg5[%c1_102, %c0_103, %c0_104, %c0_105] : memref<2x4x32x8xbf16, #tpu.memory_space<vmem>>, vector<1x4x32x8xbf16>
    %196 = vector.shape_cast %195 : vector<1x4x32x8xbf16> to vector<4x32x8xbf16>
    "tpu.trace_start"() <{level = 10 : i32, message = "hsd,hde->hse"}> : () -> ()
    %cst_106 = arith.constant dense<0.000000e+00> : vector<4x8x8xf32>
    %197 = tpu.matmul %180, %196, %cst_106 {dimension_numbers = #tpu.dot_dimension_numbers<[2], [1], [1], [2], [0, 0, 0, 1, 1, 2], [0], [0]>} : vector<4x8x32xbf16>, vector<4x32x8xbf16>, vector<4x8x8xf32> -> vector<4x8x8xf32>
    "tpu.trace_stop"() : () -> ()
    %c1_107 = arith.constant 1 : index
    %c0_108 = arith.constant 0 : index
    %c0_109 = arith.constant 0 : index
    %c0_110 = arith.constant 0 : index
    %198 = vector.load %arg8[%c1_107, %c0_108, %c0_109, %c0_110] : memref<2x4x1x8xf32, #tpu.memory_space<vmem>>, vector<1x4x1x8xf32>
    %199 = vector.shape_cast %198 : vector<1x4x1x8xf32> to vector<4x1x8xf32>
    %200 = vector.broadcast %199 : vector<4x1x8xf32> to vector<4x8x8xf32>
    %201 = arith.addf %197, %200 : vector<4x8x8xf32>
    %202 = arith.truncf %187 : vector<4x8x8xf32> to vector<4x8x8xbf16>
    %203 = arith.truncf %194 : vector<4x8x8xf32> to vector<4x8x8xbf16>
    "tpu.trace_start"() <{level = 10 : i32, message = "hqd,hkd->hqk"}> : () -> ()
    %cst_111 = arith.constant dense<0.000000e+00> : vector<4x8x8xf32>
    %204 = tpu.matmul %202, %203, %cst_111 {dimension_numbers = #tpu.dot_dimension_numbers<[2], [2], [1], [1], [0, 0, 0, 1, 1, 1], [0], [0]>} : vector<4x8x8xbf16>, vector<4x8x8xbf16>, vector<4x8x8xf32> -> vector<4x8x8xf32>
    "tpu.trace_stop"() : () -> ()
    %205 = vector.shape_cast %3 : vector<1x8xf32> to vector<1x1x8xf32>
    %206 = vector.broadcast %205 : vector<1x1x8xf32> to vector<4x8x8xf32>
    %207 = arith.addf %204, %206 : vector<4x8x8xf32>
    %cst_112 = arith.constant dense<0xFF800000> : vector<4x8xf32>
    %208 = vector.multi_reduction <maximumf>, %207, %cst_112 [2] : vector<4x8x8xf32> to vector<4x8xf32>
    %209 = vector.shape_cast %208 : vector<4x8xf32> to vector<4x8x1xf32>
    %210 = vector.broadcast %209 : vector<4x8x1xf32> to vector<4x8x8xf32>
    %211 = arith.subf %207, %210 : vector<4x8x8xf32>
    %212 = math.exp %211 : vector<4x8x8xf32>
    %cst_113 = arith.constant dense<0.000000e+00> : vector<4x8xf32>
    %213 = vector.multi_reduction <add>, %212, %cst_113 [2] : vector<4x8x8xf32> to vector<4x8xf32>
    %214 = vector.shape_cast %213 : vector<4x8xf32> to vector<4x8x1xf32>
    %215 = tpu.reciprocal %214 {approx = true} : vector<4x8x1xf32> -> vector<4x8x1xf32>
    %216 = vector.broadcast %215 : vector<4x8x1xf32> to vector<4x8x8xf32>
    %217 = arith.mulf %212, %216 : vector<4x8x8xf32>
    %218 = arith.truncf %217 : vector<4x8x8xf32> to vector<4x8x8xbf16>
    %219 = arith.truncf %201 : vector<4x8x8xf32> to vector<4x8x8xbf16>
    "tpu.trace_start"() <{level = 10 : i32, message = "hqk,hkd->hqd"}> : () -> ()
    %cst_114 = arith.constant dense<0.000000e+00> : vector<4x8x8xf32>
    %220 = tpu.matmul %218, %219, %cst_114 {dimension_numbers = #tpu.dot_dimension_numbers<[2], [1], [1], [2], [0, 0, 0, 1, 1, 2], [0], [0]>} : vector<4x8x8xbf16>, vector<4x8x8xbf16>, vector<4x8x8xf32> -> vector<4x8x8xf32>
    "tpu.trace_stop"() : () -> ()
    %221 = arith.truncf %220 : vector<4x8x8xf32> to vector<4x8x8xbf16>
    %c1_115 = arith.constant 1 : index
    %c0_116 = arith.constant 0 : index
    %c0_117 = arith.constant 0 : index
    %c0_118 = arith.constant 0 : index
    %222 = vector.load %arg9[%c1_115, %c0_116, %c0_117, %c0_118] : memref<2x4x8x32xbf16, #tpu.memory_space<vmem>>, vector<1x4x8x32xbf16>
    %223 = vector.shape_cast %222 : vector<1x4x8x32xbf16> to vector<4x8x32xbf16>
    "tpu.trace_start"() <{level = 10 : i32, message = "hqd,hde->hqe"}> : () -> ()
    %cst_119 = arith.constant dense<0.000000e+00> : vector<4x8x32xf32>
    %224 = tpu.matmul %221, %223, %cst_119 {dimension_numbers = #tpu.dot_dimension_numbers<[2], [1], [1], [2], [0, 0, 0, 1, 1, 2], [0], [0]>} : vector<4x8x8xbf16>, vector<4x8x32xbf16>, vector<4x8x32xf32> -> vector<4x8x32xf32>
    "tpu.trace_stop"() : () -> ()
    %cst_120 = arith.constant dense<0.000000e+00> : vector<8x32xf32>
    %225 = vector.multi_reduction <add>, %224, %cst_120 [0] : vector<4x8x32xf32> to vector<8x32xf32>
    %226 = arith.addf %147, %225 : vector<8x32xf32>
    %c1_121 = arith.constant 1 : index
    %c0_122 = arith.constant 0 : index
    %c0_123 = arith.constant 0 : index
    %227 = vector.load %arg10[%c1_121, %c0_122, %c0_123] : memref<2x1x32xf32, #tpu.memory_space<vmem>>, vector<1x1x32xf32>
    %228 = vector.shape_cast %227 : vector<1x1x32xf32> to vector<1x32xf32>
    %229 = vector.broadcast %228 : vector<1x32xf32> to vector<8x32xf32>
    %230 = arith.addf %226, %229 : vector<8x32xf32>
    %cst_124 = arith.constant dense<0.000000e+00> : vector<8xf32>
    %231 = vector.multi_reduction <add>, %230, %cst_124 [1] : vector<8x32xf32> to vector<8xf32>
    %232 = vector.shape_cast %231 : vector<8xf32> to vector<8x1xf32>
    %cst_125 = arith.constant 3.200000e+01 : f32
    %233 = vector.broadcast %cst_125 : f32 to vector<8x1xf32>
    %234 = arith.divf %232, %233 : vector<8x1xf32>
    %235 = vector.broadcast %234 : vector<8x1xf32> to vector<8x32xf32>
    %236 = arith.subf %230, %235 : vector<8x32xf32>
    %237 = arith.mulf %236, %236 : vector<8x32xf32>
    %cst_126 = arith.constant dense<0.000000e+00> : vector<8xf32>
    %238 = vector.multi_reduction <add>, %237, %cst_126 [1] : vector<8x32xf32> to vector<8xf32>
    %239 = vector.shape_cast %238 : vector<8xf32> to vector<8x1xf32>
    %cst_127 = arith.constant 0.0322580636 : f32
    %240 = vector.broadcast %cst_127 : f32 to vector<8x1xf32>
    %241 = arith.mulf %239, %240 : vector<8x1xf32>
    %242 = math.sqrt %241 : vector<8x1xf32>
    %cst_128 = arith.constant 9.99999997E-7 : f32
    %243 = vector.broadcast %cst_128 : f32 to vector<8x1xf32>
    %244 = arith.addf %242, %243 : vector<8x1xf32>
    %245 = tpu.reciprocal %244 : vector<8x1xf32> -> vector<8x1xf32>
    %246 = vector.broadcast %152 : vector<1x32xf32> to vector<8x32xf32>
    %247 = vector.broadcast %245 : vector<8x1xf32> to vector<8x32xf32>
    %248 = arith.mulf %246, %247 : vector<8x32xf32>
    %249 = arith.mulf %236, %248 : vector<8x32xf32>
    %250 = vector.broadcast %153 : vector<1x32xf32> to vector<8x32xf32>
    %251 = arith.addf %249, %250 : vector<8x32xf32>
    %252 = arith.truncf %251 : vector<8x32xf32> to vector<8x32xbf16>
    %c1_129 = arith.constant 1 : index
    %c0_130 = arith.constant 0 : index
    %c0_131 = arith.constant 0 : index
    %253 = vector.load %arg11[%c1_129, %c0_130, %c0_131] : memref<2x32x64xbf16, #tpu.memory_space<vmem>>, vector<1x32x64xbf16>
    %254 = vector.shape_cast %253 : vector<1x32x64xbf16> to vector<32x64xbf16>
    %cst_132 = arith.constant dense<0.000000e+00> : vector<8x64xf32>
    %255 = tpu.matmul %252, %254, %cst_132 {dimension_numbers = #tpu.dot_dimension_numbers<[1], [0], [0], [1], [0, 0, 1, 1], [], []>} : vector<8x32xbf16>, vector<32x64xbf16>, vector<8x64xf32> -> vector<8x64xf32>
    %c1_133 = arith.constant 1 : index
    %c0_134 = arith.constant 0 : index
    %c0_135 = arith.constant 0 : index
    %256 = vector.load %arg12[%c1_133, %c0_134, %c0_135] : memref<2x1x64xf32, #tpu.memory_space<vmem>>, vector<1x1x64xf32>
    %257 = vector.shape_cast %256 : vector<1x1x64xf32> to vector<1x64xf32>
    %258 = vector.broadcast %257 : vector<1x64xf32> to vector<8x64xf32>
    %259 = arith.addf %255, %258 : vector<8x64xf32>
    %cst_136 = arith.constant 0.000000e+00 : f32
    %260 = vector.broadcast %cst_136 : f32 to vector<8x64xf32>
    %261 = arith.maximumf %259, %260 : vector<8x64xf32>
    %262 = arith.truncf %261 : vector<8x64xf32> to vector<8x64xbf16>
    %c1_137 = arith.constant 1 : index
    %c0_138 = arith.constant 0 : index
    %c0_139 = arith.constant 0 : index
    %263 = vector.load %arg13[%c1_137, %c0_138, %c0_139] : memref<2x64x32xbf16, #tpu.memory_space<vmem>>, vector<1x64x32xbf16>
    %264 = vector.shape_cast %263 : vector<1x64x32xbf16> to vector<64x32xbf16>
    %cst_140 = arith.constant dense<0.000000e+00> : vector<8x32xf32>
    %265 = tpu.matmul %262, %264, %cst_140 {dimension_numbers = #tpu.dot_dimension_numbers<[1], [0], [0], [1], [0, 0, 1, 1], [], []>} : vector<8x64xbf16>, vector<64x32xbf16>, vector<8x32xf32> -> vector<8x32xf32>
    %266 = arith.addf %230, %265 : vector<8x32xf32>
    %c1_141 = arith.constant 1 : index
    %c0_142 = arith.constant 0 : index
    %c0_143 = arith.constant 0 : index
    %267 = vector.load %arg14[%c1_141, %c0_142, %c0_143] : memref<2x1x32xf32, #tpu.memory_space<vmem>>, vector<1x1x32xf32>
    %268 = vector.shape_cast %267 : vector<1x1x32xf32> to vector<1x32xf32>
    %269 = vector.broadcast %268 : vector<1x32xf32> to vector<8x32xf32>
    %270 = arith.addf %266, %269 : vector<8x32xf32>
    %cst_144 = arith.constant dense<0.000000e+00> : vector<8xf32>
    %271 = vector.multi_reduction <add>, %270, %cst_144 [1] : vector<8x32xf32> to vector<8xf32>
    %272 = vector.shape_cast %271 : vector<8xf32> to vector<8x1xf32>
    %cst_145 = arith.constant 3.200000e+01 : f32
    %273 = vector.broadcast %cst_145 : f32 to vector<8x1xf32>
    %274 = arith.divf %272, %273 : vector<8x1xf32>
    %275 = vector.broadcast %274 : vector<8x1xf32> to vector<8x32xf32>
    %276 = arith.subf %270, %275 : vector<8x32xf32>
    %277 = arith.mulf %276, %276 : vector<8x32xf32>
    %cst_146 = arith.constant dense<0.000000e+00> : vector<8xf32>
    %278 = vector.multi_reduction <add>, %277, %cst_146 [1] : vector<8x32xf32> to vector<8xf32>
    %279 = vector.shape_cast %278 : vector<8xf32> to vector<8x1xf32>
    %cst_147 = arith.constant 0.0322580636 : f32
    %280 = vector.broadcast %cst_147 : f32 to vector<8x1xf32>
    %281 = arith.mulf %279, %280 : vector<8x1xf32>
    %282 = math.sqrt %281 : vector<8x1xf32>
    %cst_148 = arith.constant 9.99999997E-7 : f32
    %283 = vector.broadcast %cst_148 : f32 to vector<8x1xf32>
    %284 = arith.addf %282, %283 : vector<8x1xf32>
    %285 = tpu.reciprocal %284 : vector<8x1xf32> -> vector<8x1xf32>
    %286 = vector.broadcast %154 : vector<1x32xf32> to vector<8x32xf32>
    %287 = vector.broadcast %285 : vector<8x1xf32> to vector<8x32xf32>
    %288 = arith.mulf %286, %287 : vector<8x32xf32>
    %289 = arith.mulf %276, %288 : vector<8x32xf32>
    %290 = vector.broadcast %155 : vector<1x32xf32> to vector<8x32xf32>
    %291 = arith.addf %289, %290 : vector<8x32xf32>
    %c0_149 = arith.constant 0 : index
    %c0_150 = arith.constant 0 : index
    %c0_151 = arith.constant 0 : index
    %292 = vector.load %arg16[%c0_149, %c0_150, %c0_151] : memref<1x8x32xf32, #tpu.memory_space<vmem>>, vector<1x8x32xf32>
    %293 = vector.shape_cast %292 : vector<1x8x32xf32> to vector<8x32xf32>
    %294 = vector.shape_cast %291 : vector<8x32xf32> to vector<1x8x32xf32>
    tpu.vector_store %arg16[%c0_149, %c0_150, %c0_151], %294 {strides = array<i32>} : memref<1x8x32xf32, #tpu.memory_space<vmem>>, vector<1x8x32xf32>,
    return
  }
  func.func @transform_0(%arg0: i32) -> (i32, i32, i32) {
    %c0_i32 = arith.constant 0 : i32
    %c0_i32_0 = arith.constant 0 : i32
    %c0_i32_1 = arith.constant 0 : i32
    return %arg0, %c0_i32, %c0_i32_0 : i32, i32, i32
  }
  func.func @transform_1(%arg0: i32) -> (i32, i32, i32) {
    %c0_i32 = arith.constant 0 : i32
    %c0_i32_0 = arith.constant 0 : i32
    %c0_i32_1 = arith.constant 0 : i32
    return %arg0, %c0_i32, %c0_i32_0 : i32, i32, i32
  }
  func.func @transform_2(%arg0: i32) -> (i32, i32, i32, i32) {
    %c0_i32 = arith.constant 0 : i32
    %c0_i32_0 = arith.constant 0 : i32
    %c0_i32_1 = arith.constant 0 : i32
    %c0_i32_2 = arith.constant 0 : i32
    %c0_i32_3 = arith.constant 0 : i32
    return %c0_i32, %c0_i32_0, %c0_i32_1, %c0_i32_2 : i32, i32, i32, i32
  }
  func.func @transform_3(%arg0: i32) -> (i32, i32, i32, i32) {
    %c0_i32 = arith.constant 0 : i32
    %c0_i32_0 = arith.constant 0 : i32
    %c0_i32_1 = arith.constant 0 : i32
    %c0_i32_2 = arith.constant 0 : i32
    %c0_i32_3 = arith.constant 0 : i32
    return %c0_i32, %c0_i32_0, %c0_i32_1, %c0_i32_2 : i32, i32, i32, i32
  }
  func.func @transform_4(%arg0: i32) -> (i32, i32, i32, i32) {
    %c0_i32 = arith.constant 0 : i32
    %c0_i32_0 = arith.constant 0 : i32
    %c0_i32_1 = arith.constant 0 : i32
    %c0_i32_2 = arith.constant 0 : i32
    %c0_i32_3 = arith.constant 0 : i32
    return %c0_i32, %c0_i32_0, %c0_i32_1, %c0_i32_2 : i32, i32, i32, i32
  }
  func.func @transform_5(%arg0: i32) -> (i32, i32, i32, i32) {
    %c0_i32 = arith.constant 0 : i32
    %c0_i32_0 = arith.constant 0 : i32
    %c0_i32_1 = arith.constant 0 : i32
    %c0_i32_2 = arith.constant 0 : i32
    %c0_i32_3 = arith.constant 0 : i32
    return %c0_i32, %c0_i32_0, %c0_i32_1, %c0_i32_2 : i32, i32, i32, i32
  }
  func.func @transform_6(%arg0: i32) -> (i32, i32, i32, i32) {
    %c0_i32 = arith.constant 0 : i32
    %c0_i32_0 = arith.constant 0 : i32
    %c0_i32_1 = arith.constant 0 : i32
    %c0_i32_2 = arith.constant 0 : i32
    %c0_i32_3 = arith.constant 0 : i32
    return %c0_i32, %c0_i32_0, %c0_i32_1, %c0_i32_2 : i32, i32, i32, i32
  }
  func.func @transform_7(%arg0: i32) -> (i32, i32, i32, i32) {
    %c0_i32 = arith.constant 0 : i32
    %c0_i32_0 = arith.constant 0 : i32
    %c0_i32_1 = arith.constant 0 : i32
    %c0_i32_2 = arith.constant 0 : i32
    %c0_i32_3 = arith.constant 0 : i32
    return %c0_i32, %c0_i32_0, %c0_i32_1, %c0_i32_2 : i32, i32, i32, i32
  }
  func.func @transform_8(%arg0: i32) -> (i32, i32, i32, i32) {
    %c0_i32 = arith.constant 0 : i32
    %c0_i32_0 = arith.constant 0 : i32
    %c0_i32_1 = arith.constant 0 : i32
    %c0_i32_2 = arith.constant 0 : i32
    %c0_i32_3 = arith.constant 0 : i32
    return %c0_i32, %c0_i32_0, %c0_i32_1, %c0_i32_2 : i32, i32, i32, i32
  }
  func.func @transform_9(%arg0: i32) -> (i32, i32, i32) {
    %c0_i32 = arith.constant 0 : i32
    %c0_i32_0 = arith.constant 0 : i32
    %c0_i32_1 = arith.constant 0 : i32
    %c0_i32_2 = arith.constant 0 : i32
    return %c0_i32, %c0_i32_0, %c0_i32_1 : i32, i32, i32
  }
  func.func @transform_10(%arg0: i32) -> (i32, i32, i32) {
    %c0_i32 = arith.constant 0 : i32
    %c0_i32_0 = arith.constant 0 : i32
    %c0_i32_1 = arith.constant 0 : i32
    %c0_i32_2 = arith.constant 0 : i32
    return %c0_i32, %c0_i32_0, %c0_i32_1 : i32, i32, i32
  }
  func.func @transform_11(%arg0: i32) -> (i32, i32, i32) {
    %c0_i32 = arith.constant 0 : i32
    %c0_i32_0 = arith.constant 0 : i32
    %c0_i32_1 = arith.constant 0 : i32
    %c0_i32_2 = arith.constant 0 : i32
    return %c0_i32, %c0_i32_0, %c0_i32_1 : i32, i32, i32
  }
  func.func @transform_12(%arg0: i32) -> (i32, i32, i32) {
    %c0_i32 = arith.constant 0 : i32
    %c0_i32_0 = arith.constant 0 : i32
    %c0_i32_1 = arith.constant 0 : i32
    %c0_i32_2 = arith.constant 0 : i32
    return %c0_i32, %c0_i32_0, %c0_i32_1 : i32, i32, i32
  }
  func.func @transform_13(%arg0: i32) -> (i32, i32, i32) {
    %c0_i32 = arith.constant 0 : i32
    %c0_i32_0 = arith.constant 0 : i32
    %c0_i32_1 = arith.constant 0 : i32
    %c0_i32_2 = arith.constant 0 : i32
    return %c0_i32, %c0_i32_0, %c0_i32_1 : i32, i32, i32
  }
  func.func @transform_14(%arg0: i32) -> (i32, i32, i32) {
    %c0_i32 = arith.constant 0 : i32
    %c0_i32_0 = arith.constant 0 : i32
    %c0_i32_1 = arith.constant 0 : i32
    %c0_i32_2 = arith.constant 0 : i32
    return %c0_i32, %c0_i32_0, %c0_i32_1 : i32, i32, i32
  }
  func.func @transform_15(%arg0: i32) -> (i32, i32, i32) {
    %c0_i32 = arith.constant 0 : i32
    %c0_i32_0 = arith.constant 0 : i32
    %c0_i32_1 = arith.constant 0 : i32
    return %arg0, %c0_i32, %c0_i32_0 : i32, i32, i32
  }
}

</mosaic_0001>

<bundles_post_ra>
// kernel: tpu_custom_call.1
= control target key start
LH: loop header
LB: loop body
LE: loop exit
PB: predicated region body
PF: predicated region fallthrough
CT: control target
= control target key end

     0   :  { %s5768_s0 = inlined_call_operand.vmem [shape: f32[2,8,32], index: 0, kind: input, shape index: {}]   ;;  %s5769_s1 = inlined_call_operand.vmem [shape: f32[2,1,8], index: 1, kind: input, shape index: {}]   ;;  %s5770_s2 = inlined_call_operand.vmem [shape: bf16[2,4,32,8], index: 2, kind: input, shape index: {}]   ;;  %s5771_s3 = inlined_call_operand.vmem [shape: bf16[2,4,32,8], index: 3, kind: input, shape index: {}]   ;;  %s5772_s4 = inlined_call_operand.vmem [shape: bf16[2,4,32,8], index: 4, kind: input, shape index: {}]   ;;  %s5773_s5 = inlined_call_operand.vmem [shape: f32[2,4,1,8], index: 5, kind: input, shape index: {}]   ;;  %s5774_s6 = inlined_call_operand.vmem [shape: f32[2,4,1,8], index: 6, kind: input, shape index: {}]   ;;  %s5775_s7 = inlined_call_operand.vmem [shape: f32[2,4,1,8], index: 7, kind: input, shape index: {}]   ;;  %s5776_s8 = inlined_call_operand.vmem [shape: bf16[2,4,8,32], index: 8, kind: input, shape index: {}]   ;;  %s5777_s9 = inlined_call_operand.vmem [shape: f32[2,1,32], index: 9, kind: input, shape index: {}]   ;;  %s5778_s10 = inlined_call_operand.vmem [shape: bf16[2,32,64], index: 10, kind: input, shape index: {}]   ;;  %s5779_s11 = inlined_call_operand.vmem [shape: f32[2,1,64], index: 11, kind: input, shape index: {}]   ;;  %s5780_s12 = inlined_call_operand.vmem [shape: bf16[2,64,32], index: 12, kind: input, shape index: {}]   ;;  %s5781_s13 = inlined_call_operand.vmem [shape: f32[2,1,32], index: 13, kind: input, shape index: {}]   ;;  %s5782_s14 = inlined_call_operand.vmem [shape: f32[2,6,32], index: 14, kind: input, shape index: {}]   ;;  %s5783_s15 = inlined_call_operand.hbm [shape: f32[2,8,32], index: 15, kind: output, shape index: {}]  }
   0x1   :  { %5785 = sst [smem:[#allocation7_spill]] %s5768_s0 }
   0x2   :  { %5786 = sst [smem:[#allocation8_spill]] %s5769_s1 }
   0x3   :  { %5787 = sst [smem:[#allocation9_spill]] %s5770_s2 }
   0x4   :  { %20 = vsyncpa [#allocation3], 0 }
   0x5   :  { %22 = vsyncpa [#allocation3 + $0x1], 0  ;;  %s4945_s18 = smov 0   ;;  %s4947_s19 = smov 0  }
   0x6   :  { %s4949_s20 = smov 0   ;;  %s4951_s21 = smov 0  }
   0x7 LB: > { %5788 = sst [smem:[#allocation5_spill]] %s4856_s20  ;;  %s4966_s22 = sadd.s32 4294967295, %s4860_s21   ;;  %s4860_s21 = sphi %s4951_s21, %s5800_s21   ;;  %s4856_s20 = sphi %s4949_s20, %s5799_s20   ;;  %s4852_s19 = sphi %s4947_s19, %s5798_s19   ;;  %s4848_s18 = sphi %s4945_s18, %s5797_s18  }
   0x8   : > { %s3894_s23 = sadd.s32 4294967294, %s4860_s21   ;;  %s4970_s24 = sadd.s32 1, %s4860_s21  }
   0x9   : > { %s360_s25 = sadd.s32 1, %s4856_s20  ;;  %s357_s26 = ssub.s32 %s4860_s21, %s4970_s24 }
   0xa   : > { %p370_p0 = scmp.ne.s32.totalorder %s4856_s20, %s4852_s19  ;;  %p358_p1 = scmp.eq.s32.totalorder %s357_s26, 0 }
   0xb   : > { %p371_p2 = scmp.eq.s32.totalorder %s4966_s22, 1  ;;  %p376_p3 = scmp.ne.s32.totalorder %s4852_s19, %s4848_s18 }
   0xc   : > { %p377_p4 = scmp.eq.s32.totalorder %s3894_s23, 1  ;;  %p3897_p7 = scmp.ge.s32.totalorder %s4860_s21, 1 }
   0xd   : > { %s4981_s27 = scalar_select %p358_p1, %s4856_s20, %s360_s25  }
   0xe   : > { %p4983_p5 = por %p371_p2, %p370_p0  ;;  %p4987_p6 = por %p377_p4, %p376_p3 }
   0xf   : > { %5789 = sst [smem:[#allocation6_spill]] %s4981_s27  ;;  %p447_p8 = scmp.lt.s32.totalorder %s4860_s21, 3 }
  0x11   : > { %p448_p9 = pnand %p3897_p7, %p447_p8 }
  0x12   : > { %p497_p10 = scmp.lt.s32.totalorder (!%p448_p9), %s4966_s22, 1  ;;  %vm508_vm0 = vcmask (!%p448_p9), 261120   ;;  %s5792_s0 = sld [smem:[#allocation7_spill]] (!%p448_p9)  ;;  %v4862_v9 = vmov (!%p448_p9), 0.0   ;;  %vm4863_vm1 = vmmov (!%p448_p9), 0   ;;  %v529_v16 = vlaneseq (!%p448_p9)  ;;  %v4685_v32 = vld [vmem:[%s5771_s3] sm:$0xff] (!%p448_p9)  }
  0x13   : > { %451 = sbr.rel (%p448_p9) target bundleno = 5327 (0x14cf), region = 80  ;;  %s5793_s2 = sld [smem:[#allocation9_spill]] (!%p448_p9)  ;;  %4263 = vmatprep.subr.bf16.mxu1 (!%p448_p9), %v4862_v9  ;;  %4279 = vmatprep.subr.bf16.mxu0 (!%p448_p9), %v4862_v9  ;;  %v5034_v23 = vld [vmem:[%s5782_s14] sm:$0x3f] (!%p448_p9)  ;;  %v4687_v35 = vld [vmem:[%s5771_s3 + $0x8] sm:$0xff] (!%p448_p9)   ;;  %v4692_v40 = vld [vmem:[%s5771_s3 + $0x10] sm:$0xff] (!%p448_p9)  }
  0x14   : > { %4267 = vmatprep.mubr.msk.bf16.mxu1 (!%p448_p9), %vm4863_vm1, %v4862_v9  ;;  %4283 = vmatprep.mubr.msk.bf16.mxu0 (!%p448_p9), %vm4863_vm1, %v4862_v9  ;;  %v5028_v21 = vshrl.u32 (!%p448_p9), %v529_v16, 7  ;;  %v4689_v37 = vld [vmem:[%s5771_s3 + $0x20] sm:$0xff] (!%p448_p9)   ;;  %v4691_v39 = vld [vmem:[%s5771_s3 + $0x28] sm:$0xff] (!%p448_p9)   ;;  %v4694_v42 = vld [vmem:[%s5771_s3 + $0x18] sm:$0xff] (!%p448_p9)   ;;  %vm1314_vm4 = vcmask (!%p448_p9), 64512   ;;  %vm1554_vm5 = vcmask (!%p448_p9), 1043456  }
  0x15   : > { %v4693_v41 = vld [vmem:[%s5772_s4] sm:$0xff] (!%p448_p9)   ;;  %v4695_v43 = vld [vmem:[%s5772_s4 + $0x8] sm:$0xff] (!%p448_p9)   ;;  %v4696_v44 = vld [vmem:[%s5771_s3 + $0x30] sm:$0xff] (!%p448_p9)   ;;  %s5794_s1 = sld [smem:[#allocation8_spill]] (!%p448_p9)  ;;  %vm2075_vm8 = vcmask (!%p448_p9), 523264   ;;  %s4124_s17 = sshll.u32 (!%p448_p9), %s4966_s22, 7 }
  0x16   : > { %v531_v22 = vsub.s32 (!%p448_p9), 0, %v5028_v21  ;;  %v537_v25 = vsub.s32 (!%p448_p9), 1, %v5028_v21  ;;  %v4697_v45 = vld [vmem:[%s5772_s4 + $0x20] sm:$0xff] (!%p448_p9)   ;;  %v4698_v46 = vld [vmem:[%s5771_s3 + $0x38] sm:$0xff] (!%p448_p9)   ;;  %v4699_v47 = vld [vmem:[%s5772_s4 + $0x28] sm:$0xff] (!%p448_p9)  }
  0x17   : > { %v4700_v48 = vld [vmem:[%s5772_s4 + $0x10] sm:$0xff] (!%p448_p9)   ;;  %v4701_v49 = vld [vmem:[%s5772_s4 + $0x18] sm:$0xff] (!%p448_p9)   ;;  %v3916_v60 = vld [vmem:[%s5774_s6] ss:$0 sm:$0xff] (!%p448_p9) }
  0x18   : > { %v532_v24 = vrot.slane (!%p448_p9), %v5034_v23, %v531_v22  ;;  %v538_v27 = vrot.slane (!%p448_p9), %v5034_v23, %v537_v25  ;;  %v4702_v50 = vld [vmem:[%s5772_s4 + $0x30] sm:$0xff] (!%p448_p9)   ;;  %v4703_v51 = vld [vmem:[%s5772_s4 + $0x38] sm:$0xff] (!%p448_p9)  }
  0x19   : > { %v4680_v7 = vld [vmem:[%s5793_s2] sm:$0xff] (!%p448_p9)   ;;  %v4682_v10 = vld [vmem:[%s5793_s2 + $0x8] sm:$0xff] (!%p448_p9)   ;;  %v4684_v31 = vld [vmem:[%s5793_s2 + $0x10] sm:$0xff] (!%p448_p9)  }
  0x1a   : > { %s4995_s30 = scalar_select %p497_p10, %s4966_s22, 1  ;;  %v4681_v8 = vld [vmem:[%s5793_s2 + $0x20] sm:$0xff]   ;;  %4264 = vmatpush3.bf16.msra.mxu1 %v4680_v7  ;;  %v4683_v11 = vld [vmem:[%s5793_s2 + $0x28] sm:$0xff]   ;;  %v4686_v34 = vld [vmem:[%s5793_s2 + $0x18] sm:$0xff]  }
  0x1b   : > { %4280 = vmatpush3.bf16.msra.mxu0 %v4681_v8  ;;  %4265 = vmatprep.subr.bf16.mxu1 %v4862_v9  ;;  %v4688_v36 = vld [vmem:[%s5793_s2 + $0x30] sm:$0xff]   ;;  %v4690_v38 = vld [vmem:[%s5793_s2 + $0x38] sm:$0xff]   ;;  %v3900_v7 = vld [vmem:[%s5773_s5] ss:$0 sm:$0xff]  ;;  %s4864_s22 = smov [#allocation2]  }
  0x1c   : > { %s3899_s16 = sshll.u32 %s4995_s30, 3  ;;  %4281 = vmatprep.subr.bf16.mxu0 %v4862_v9  ;;  %s5235_s27 = scalar_lea.vmem %s5794_s1, %s4995_s30 }
  0x1d   : > { %s5001_s25 = scalar_lea.vmem %s5792_s0, %s3899_s16  ;;  %s494_s0 = sand.u32 1, %s4852_s19  }
  0x1e   : > { %v505_v0 = vld [vmem:[%s5001_s25] sm:$0xff]  ;;  %4266 = vmatpush3.bf16.msra.mxu1 %v4682_v10  ;;  %s3898_s20 = sshll.u32 %s494_s0, 3  ;;  %s5725_s30 = scalar_lea.hbm %s5783_s15, %s4124_s17 }
  0x1f   : > { %v509_v1 = vsel %vm508_vm0, %v505_v0, 0.0  ;;  %4282 = vmatpush3.bf16.msra.mxu0 %v4683_v11  ;;  %4271 = vmatprep.subr.bf16.mxu1 %v4862_v9  ;;  %v3918_v10 = vld [vmem:[%s5774_s6 + $0x2] ss:$0 sm:$0xff]  ;;  %s3813_s26 = scalar_lea.sflag [#allocation3], %s494_s0 }
  0x20   : > { %510 = vadd.xlane.f32.xlu0 %v509_v1  ;;  %4295 = vmatprep.subr.bf16.mxu0 %v4862_v9 }
  0xad   : > { %v511_v2 = vpop.xlane.xlu0 %510 }
  0xae   : > { %v513_v3 = vmul.f32 0.03125, %v511_v2 }
  0xb0   : > { %v514_v4 = vsub.f32 %v505_v0, %v513_v3 }
  0xb2   : > { %v515_v5 = vmul.f32 %v514_v4, %v514_v4 }
  0xb4   : > { %v516_v6 = vsel %vm508_vm0, %v515_v5, 0.0 }
  0xb5   : > { %517 = vadd.xlane.f32.xlu0 %v516_v6 }
 0x142   : > { %v518_v12 = vpop.xlane.xlu0 %517 }
 0x143   : > { %v519_v13 = vmul.f32 0.032258064, %v518_v12 }
 0x145   : > { %4740 = vrsqrt.f32 %v519_v13  ;;  %vm522_vm2 = vcmp.eq.f32.partialorder %v519_v13, inf  ;;  %v525_v17 = vand.u32 2147483648, %v519_v13  ;;  %vm524_vm3 = vcmp.eq.f32.partialorder %v519_v13, 0.0 }
 0x14f   : > { %v4741_v14 = vpop.eup %4740 }
 0x150   : > { %v521_v15 = vmul.f32 %v4741_v14, %v519_v13 }
 0x152   : > { %v523_v18 = vsel %vm522_vm2, %v519_v13, %v521_v15 }
 0x153   : > { %v526_v19 = vsel %vm524_vm3, %v525_v17, %v523_v18 }
 0x154   : > { %v527_v20 = vadd.f32 1e-06, %v526_v19 }
 0x156   : > { %4742 = vrcp.f32 %v527_v20 }
 0x160   : > { %v4743_v26 = vpop.eup %4742 }
 0x161   : > { %v533_v28 = vmul.f32 %v4743_v26, %v532_v24 }
 0x163   : > { %v534_v29 = vmul.f32 %v533_v28, %v514_v4 }
 0x165   : > { %v539_v30 = vadd.f32 %v538_v27, %v534_v29  ;;  %v3902_v27 = vld [vmem:[%s5773_s5 + $0x2] ss:$0 sm:$0xff]  ;;  %v3917_v29 = vld [vmem:[%s5774_s6 + $0x1] ss:$0 sm:$0xff] }
 0x167   : > { %v5049_v33 = vpack.c.bf16 %v539_v30, %v539_v30  ;;  %v3932_v30 = vld [vmem:[%s5775_s7] ss:$0 sm:$0xff] }
 0x169   : > { %4268 = vmatmul.mubr.msk.bf16.vlgmr.msra.gmra.mrb[0].mxu1 %vm508_vm0, %v5049_v33  ;;  %4284 = vmatmul.mubr.msk.bf16.vlgmr.msra.gmra.mrb[0].mxu0 %vm508_vm0, %v5049_v33 }
 0x16a   : > { %4272 = vmatpush3.bf16.msra.mxu1 %v4684_v31  ;;  %4296 = vmatpush3.bf16.msra.mxu0 %v4685_v32 }
 0x16b   : > { %4273 = vmatprep.subr.bf16.mxu1 %v4862_v9  ;;  %4297 = vmatprep.subr.bf16.mxu0 %v4862_v9 }
 0x16c   : > { %4275 = vmatprep.mubr.msk.bf16.mxu1 %vm4863_vm1, %v4862_v9  ;;  %4299 = vmatprep.mubr.msk.bf16.mxu0 %vm4863_vm1, %v4862_v9 }
 0x16e   : > { %4274 = vmatpush3.bf16.msra.mxu1 %v4686_v34  ;;  %4298 = vmatpush3.bf16.msra.mxu0 %v4687_v35 }
 0x16f   : > { %4287 = vmatprep.subr.bf16.mxu1 %v4862_v9  ;;  %4311 = vmatprep.subr.bf16.mxu0 %v4862_v9 }
 0x171   : > { %4276 = vmatmul.mubr.msk.bf16.vlgmr.msra.gmra.mrb[4].mxu1 %vm508_vm0, %v5049_v33  ;;  %4300 = vmatmul.mubr.msk.bf16.vlgmr.msra.gmra.mrb[4].mxu0 %vm508_vm0, %v5049_v33 }
 0x172   : > { %4288 = vmatpush3.bf16.msra.mxu1 %v4688_v36  ;;  %4312 = vmatpush3.bf16.msra.mxu0 %v4689_v37 }
 0x173   : > { %4289 = vmatprep.subr.bf16.mxu1 %v4862_v9  ;;  %4313 = vmatprep.subr.bf16.mxu0 %v4862_v9 }
 0x174   : > { %4291 = vmatprep.mubr.msk.bf16.mxu1 %vm4863_vm1, %v4862_v9  ;;  %4315 = vmatprep.mubr.msk.bf16.mxu0 %vm4863_vm1, %v4862_v9 }
 0x176   : > { %4290 = vmatpush3.bf16.msra.mxu1 %v4690_v38  ;;  %4314 = vmatpush3.bf16.msra.mxu0 %v4691_v39 }
 0x177   : > { %4303 = vmatprep.subr.bf16.mxu1 %v4862_v9  ;;  %4327 = vmatprep.subr.bf16.mxu0 %v4862_v9 }
 0x179   : > { %4292 = vmatmul.mubr.msk.bf16.vlgmr.msra.gmra.mrb[8].mxu1 %vm508_vm0, %v5049_v33  ;;  %4316 = vmatmul.mubr.msk.bf16.vlgmr.msra.gmra.mrb[8].mxu0 %vm508_vm0, %v5049_v33 }
 0x17a   : > { %4304 = vmatpush3.bf16.msra.mxu1 %v4692_v40  ;;  %4328 = vmatpush3.bf16.msra.mxu0 %v4693_v41 }
 0x17b   : > { %4305 = vmatprep.subr.bf16.mxu1 %v4862_v9  ;;  %4329 = vmatprep.subr.bf16.mxu0 %v4862_v9 }
 0x17c   : > { %4307 = vmatprep.mubr.msk.bf16.mxu1 %vm4863_vm1, %v4862_v9  ;;  %4331 = vmatprep.mubr.msk.bf16.mxu0 %vm4863_vm1, %v4862_v9 }
 0x17e   : > { %4306 = vmatpush3.bf16.msra.mxu1 %v4694_v42  ;;  %4330 = vmatpush3.bf16.msra.mxu0 %v4695_v43 }
 0x17f   : > { %4319 = vmatprep.subr.bf16.mxu1 %v4862_v9  ;;  %4343 = vmatprep.subr.bf16.mxu0 %v4862_v9 }
 0x181   : > { %4308 = vmatmul.mubr.msk.bf16.vlgmr.msra.gmra.mrb[12].mxu1 %vm508_vm0, %v5049_v33  ;;  %4332 = vmatmul.mubr.msk.bf16.vlgmr.msra.gmra.mrb[12].mxu0 %vm508_vm0, %v5049_v33 }
 0x182   : > { %4320 = vmatpush3.bf16.msra.mxu1 %v4696_v44  ;;  %4344 = vmatpush3.bf16.msra.mxu0 %v4697_v45  ;;  %v3901_v45 = vld [vmem:[%s5773_s5 + $0x1] ss:$0 sm:$0xff] }
 0x183   : > { %4321 = vmatprep.subr.bf16.mxu1 %v4862_v9  ;;  %4345 = vmatprep.subr.bf16.mxu0 %v4862_v9 }
 0x184   : > { %4323 = vmatprep.mubr.msk.bf16.mxu1 %vm4863_vm1, %v4862_v9  ;;  %4347 = vmatprep.mubr.msk.bf16.mxu0 %vm4863_vm1, %v4862_v9 }
 0x186   : > { %4322 = vmatpush3.bf16.msra.mxu1 %v4698_v46  ;;  %4346 = vmatpush3.bf16.msra.mxu0 %v4699_v47 }
 0x187   : > { %4335 = vmatprep.subr.bf16.mxu1 %v4862_v9  ;;  %4359 = vmatprep.subr.bf16.mxu0 %v4862_v9 }
 0x189   : > { %4324 = vmatmul.mubr.msk.bf16.vlgmr.msra.gmra.mrb[16].mxu1 %vm508_vm0, %v5049_v33  ;;  %4348 = vmatmul.mubr.msk.bf16.vlgmr.msra.gmra.mrb[16].mxu0 %vm508_vm0, %v5049_v33 }
 0x18a   : > { %4336 = vmatpush3.bf16.msra.mxu1 %v4700_v48  ;;  %4339 = vmatprep.mubr.msk.bf16.mxu1 %vm4863_vm1, %v4862_v9  ;;  %v3919_v48 = vld [vmem:[%s5774_s6 + $0x3] ss:$0 sm:$0xff] }
 0x18b   : > { %4337 = vmatprep.subr.bf16.mxu1 %v4862_v9  ;;  %4361 = vmatprep.mubr.msk.bf16.mxu0 %vm4863_vm1, %v4862_v9 }
 0x18e   : > { %4338 = vmatpush3.bf16.msra.mxu1 %v4701_v49 }
 0x18f   : > { %4351 = vmatprep.subr.bf16.mxu1 %v4862_v9 }
 0x191   : > { %4340 = vmatmul.mubr.msk.bf16.vlgmr.msra.gmra.mrb[20].mxu1 %vm508_vm0, %v5049_v33 }
 0x192   : > { %4352 = vmatpush3.bf16.msra.mxu1 %v4702_v50  ;;  %4355 = vmatprep.mubr.msk.bf16.mxu1 %vm4863_vm1, %v4862_v9 }
 0x193   : > { %4353 = vmatprep.subr.bf16.mxu1 %v4862_v9 }
 0x196   : > { %4354 = vmatpush3.bf16.msra.mxu1 %v4703_v51 }
 0x197   : > { %4365 = vmatprep.subr.bf16.mxu1 %v4862_v9 }
 0x199   : > { %4356 = vmatmul.mubr.msk.bf16.vlgmr.msra.gmra.mrb[24].mxu1 %vm508_vm0, %v5049_v33 }
 0x19a   : > { %4367 = vmatprep.mubr.msk.bf16.mxu1 %vm4863_vm1, %v4862_v9 }
 0x23c   : > { %v634_v52 = vpop.f32.mrb[0].mxu1  ;;  %v738_v53 = vpop.f32.mrb[0].mxu0 }
 0x23d   : > { %v4269_v54 = vpop.f32.mrb[1].mxu1  ;;  %v4285_v55 = vpop.f32.mrb[1].mxu0  ;;  %v635_v11 = vadd.f32 %v3900_v7, %v634_v52  ;;  %v739_v31 = vadd.f32 %v3902_v27, %v738_v53 }
 0x23e   : > { %v637_v56 = vpop.f32.mrb[2].mxu1  ;;  %v741_v57 = vpop.f32.mrb[2].mxu0 }
 0x23f   : > { %v4270_v58 = vpop.f32.mrb[3].mxu1  ;;  %v4286_v59 = vpop.f32.mrb[3].mxu0  ;;  %v1300_v19 = vpack.c.bf16 %v635_v11, %v635_v11  ;;  %v1302_v40 = vpack.c.bf16 %v739_v31, %v739_v31 }
 0x244   : > { %v686_v61 = vpop.f32.mrb[4].mxu1  ;;  %v886_v62 = vpop.f32.mrb[4].mxu0 }
 0x245   : > { %v887_v63 = vadd.f32 %v3916_v60, %v886_v62  ;;  %v4277_v0 = vpop.f32.mrb[5].mxu1  ;;  %v4301_v1 = vpop.f32.mrb[5].mxu0  ;;  %v687_v49 = vadd.f32 %v3901_v45, %v686_v61  ;;  %v3903_v61 = vld [vmem:[%s5773_s5 + $0x3] ss:$0 sm:$0xff] }
 0x246   : > { %v689_v2 = vpop.f32.mrb[6].mxu1  ;;  %v889_v3 = vpop.f32.mrb[6].mxu0 }
 0x247   : > { %v1304_v4 = vpack.c.bf16 %v887_v63, %v887_v63  ;;  %v4278_v5 = vpop.f32.mrb[7].mxu1  ;;  %v4302_v6 = vpop.f32.mrb[7].mxu0  ;;  %v1301_v57 = vpack.c.bf16 %v687_v49, %v687_v49  ;;  %v3933_v63 = vld [vmem:[%s5775_s7 + $0x1] ss:$0 sm:$0xff] }
 0x249   : > { %v1319_v8 = vsel %vm1314_vm4, %v1304_v4, 0 }
 0x24a   : > { %4360 = vmatpush3.bf16.xpose.msra.mxu0 %v1319_v8 }
 0x24b   : > { %4371 = vmatprep.subr.bf16.mxu0 %v4862_v9 }
 0x24c   : > { %v790_v12 = vpop.f32.mrb[8].mxu1  ;;  %v990_v13 = vpop.f32.mrb[8].mxu0 }
 0x24d   : > { %v991_v14 = vadd.f32 %v3918_v10, %v990_v13  ;;  %v4293_v15 = vpop.f32.mrb[9].mxu1  ;;  %v4317_v16 = vpop.f32.mrb[9].mxu0  ;;  %v791_v0 = vadd.f32 %v3903_v61, %v790_v12 }
 0x24e   : > { %v793_v17 = vpop.f32.mrb[10].mxu1  ;;  %v993_v18 = vpop.f32.mrb[10].mxu0 }
 0x24f   : > { %v1306_v20 = vpack.c.bf16 %v991_v14, %v991_v14  ;;  %v4294_v24 = vpop.f32.mrb[11].mxu1  ;;  %v4318_v26 = vpop.f32.mrb[11].mxu0  ;;  %v1303_v5 = vpack.c.bf16 %v791_v0, %v791_v0  ;;  %v5238_v14 = vld [vmem:[%s5235_s27] ss:$0 sm:$0xff] }
 0x251   : > { %v1411_v28 = vsel %vm1314_vm4, %v1306_v20, 0  ;;  %4362 = vmatmul.mubr.msk.bf16.vlgmr.msra.gmra.mrb[20].mxu0 %vm1314_vm4, %v1300_v19 }
 0x252   : > { %4372 = vmatpush3.bf16.xpose.msra.mxu0 %v1411_v28  ;;  %4373 = vmatprep.mubr.msk.bf16.mxu0 %vm4863_vm1, %v4862_v9 }
 0x253   : > { %4383 = vmatprep.subr.bf16.mxu0 %v4862_v9 }
 0x254   : > { %v938_v32 = vpop.f32.mrb[12].mxu1  ;;  %v1138_v33 = vpop.f32.mrb[12].mxu0 }
 0x255   : > { %v939_v34 = vadd.f32 %v3917_v29, %v938_v32  ;;  %v1139_v35 = vadd.f32 %v3932_v30, %v1138_v33  ;;  %v4309_v36 = vpop.f32.mrb[13].mxu1  ;;  %v4333_v37 = vpop.f32.mrb[13].mxu0 }
 0x256   : > { %v941_v38 = vpop.f32.mrb[14].mxu1  ;;  %v1141_v39 = vpop.f32.mrb[14].mxu0 }
 0x257   : > { %v1305_v41 = vpack.c.bf16 %v939_v34, %v939_v34  ;;  %v1547_v42 = vpack.c.bf16 %v1139_v35, %v1139_v35  ;;  %v4310_v43 = vpop.f32.mrb[15].mxu1  ;;  %v4334_v44 = vpop.f32.mrb[15].mxu0 }
 0x259   : > { %v1365_v46 = vsel %vm1314_vm4, %v1305_v41, 0  ;;  %v1556_v47 = vsel %vm1554_vm5, %v1547_v42, 0  ;;  %4374 = vmatmul.mubr.msk.bf16.vlgmr.msra.gmra.mrb[24].mxu0 %vm1314_vm4, %v1302_v40 }
 0x25a   : > { %4366 = vmatpush3.bf16.xpose.msra.mxu1 %v1365_v46  ;;  %4384 = vmatpush3.bf16.msra.mxu0 %v1556_v47 }
 0x25b   : > { %4377 = vmatprep.subr.bf16.mxu1 %v4862_v9  ;;  %4385 = vmatprep.mubr.msk.bf16.mxu0 %vm4863_vm1, %v4862_v9 }
 0x25c   : > { %v1042_v50 = vpop.f32.mrb[16].mxu1  ;;  %v5210_v51 = vpop.f32.mrb[16].mxu0  ;;  %4395 = vmatprep.subr.bf16.mxu0 %v4862_v9 }
 0x25d   : > { %v1043_v52 = vadd.f32 %v3919_v48, %v1042_v50  ;;  %v4325_v53 = vpop.f32.mrb[17].mxu1  ;;  %v4349_v54 = vpop.f32.mrb[17].mxu0 }
 0x25e   : > { %v1045_v55 = vpop.f32.mrb[18].mxu1  ;;  %v1245_v56 = vpop.f32.mrb[18].mxu0 }
 0x25f   : > { %v1307_v58 = vpack.c.bf16 %v1043_v52, %v1043_v52  ;;  %v4326_v59 = vpop.f32.mrb[19].mxu1  ;;  %v4350_v60 = vpop.f32.mrb[19].mxu0 }
 0x261   : > { %v1457_v62 = vsel %vm1314_vm4, %v1307_v58, 0  ;;  %4368 = vmatmul.mubr.msk.bf16.vlgmr.msra.gmra.mrb[28].mxu1 %vm1314_vm4, %v1301_v57 }
 0x262   : > { %4378 = vmatpush3.bf16.xpose.msra.mxu1 %v1457_v62  ;;  %4379 = vmatprep.mubr.msk.bf16.mxu1 %vm4863_vm1, %v4862_v9 }
 0x263   : > { %4389 = vmatprep.subr.bf16.mxu1 %v4862_v9 }
 0x264   : > { %v1190_v1 = vpop.f32.mrb[20].mxu1 }
 0x265   : > { %v1191_v2 = vadd.f32 %v3933_v63, %v1190_v1  ;;  %v4341_v3 = vpop.f32.mrb[21].mxu1  ;;  %v3934_v1 = vld [vmem:[%s5775_s7 + $0x2] ss:$0 sm:$0xff] }
 0x266   : > { %v1193_v4 = vpop.f32.mrb[22].mxu1 }
 0x267   : > { %v1548_v6 = vpack.c.bf16 %v1191_v2, %v1191_v2  ;;  %v4342_v7 = vpop.f32.mrb[23].mxu1  ;;  %v1243_v2 = vadd.f32 %v3934_v1, %v5210_v51 }
 0x269   : > { %v1602_v8 = vsel %vm1554_vm5, %v1548_v6, 0  ;;  %4380 = vmatmul.mubr.msk.bf16.vlgmr.msra.gmra.mrb[32].mxu1 %vm1314_vm4, %v1303_v5  ;;  %v1549_v5 = vpack.c.bf16 %v1243_v2, %v1243_v2 }
 0x26a   : > { %4390 = vmatpush3.bf16.msra.mxu1 %v1602_v8  ;;  %4391 = vmatprep.mubr.msk.bf16.mxu1 %vm4863_vm1, %v4862_v9 }
 0x26b   : > { %4401 = vmatprep.subr.bf16.mxu1 %v4862_v9  ;;  %v1648_v8 = vsel %vm1554_vm5, %v1549_v5, 0 }
 0x26c   : > { %v5229_v10 = vpop.f32.mrb[24].mxu1 }
 0x26d   : > { %v4357_v11 = vpop.f32.mrb[25].mxu1 }
 0x26e   : > { %v1297_v12 = vpop.f32.mrb[26].mxu1 }
 0x26f   : > { %v4358_v13 = vpop.f32.mrb[27].mxu1 }
 0x270   : > { %v3935_v13 = vld [vmem:[%s5775_s7 + $0x3] ss:$0 sm:$0xff] }
 0x324   : > { %v1355_v15 = vpop.f32.mrb[20].mxu0 }
 0x325   : > { %v1356_v16 = vadd.f32 %v5238_v14, %v1355_v15  ;;  %v4363_v17 = vpop.f32.mrb[21].mxu0 }
 0x326   : > { %v1358_v18 = vpop.f32.mrb[22].mxu0 }
 0x327   : > { %v4364_v19 = vpop.f32.mrb[23].mxu0  ;;  %v1499_v20 = vsel %vm1314_vm4, %v1356_v16, -inf }
 0x328   : > { %1500 = vmax.xlane.f32.xlu1 %v1499_v20 }
 0x32c   : > { %v1447_v24 = vpop.f32.mrb[24].mxu0 }
 0x32d   : > { %v1448_v26 = vadd.f32 %v5238_v14, %v1447_v24  ;;  %v4375_v27 = vpop.f32.mrb[25].mxu0 }
 0x32e   : > { %v1450_v28 = vpop.f32.mrb[26].mxu0 }
 0x32f   : > { %v4376_v29 = vpop.f32.mrb[27].mxu0  ;;  %v1505_v30 = vsel %vm1314_vm4, %v1448_v26, -inf }
 0x330   : > { %1506 = vmax.xlane.f32.xlu0 %v1505_v30  ;;  %v1740_v29 = vld [vmem:[%s5776_s8] sm:$0xf] }
 0x331   : > { %v1748_v30 = vsel %vm1554_vm5, %v1740_v29, 0 }
 0x334   : > { %v1401_v31 = vpop.f32.mrb[28].mxu1 }
 0x335   : > { %v1402_v32 = vadd.f32 %v5238_v14, %v1401_v31  ;;  %v4369_v33 = vpop.f32.mrb[29].mxu1  ;;  %v1741_v31 = vld [vmem:[%s5776_s8 + $0x4] sm:$0xf] }
 0x336   : > { %v1404_v34 = vpop.f32.mrb[30].mxu1  ;;  %v1742_v33 = vld [vmem:[%s5776_s8 + $0x8] sm:$0xf] }
 0x337   : > { %v4370_v35 = vpop.f32.mrb[31].mxu1  ;;  %v1502_v36 = vsel %vm1314_vm4, %v1402_v32, -inf }
 0x338   : > { %1503 = vmax.xlane.f32.xlu1 %v1502_v36 }
 0x33c   : > { %v1493_v37 = vpop.f32.mrb[32].mxu1 }
 0x33d   : > { %v1494_v38 = vadd.f32 %v5238_v14, %v1493_v37  ;;  %v4381_v39 = vpop.f32.mrb[33].mxu1  ;;  %v1840_v37 = vsel %vm1554_vm5, %v1742_v33, 0  ;;  %v4705_v33 = vld [vmem:[%s5778_s10 + $0x8] sm:$0xff]  }
 0x33e   : > { %v1496_v40 = vpop.f32.mrb[34].mxu1 }
 0x33f   : > { %v4382_v41 = vpop.f32.mrb[35].mxu1  ;;  %v1508_v42 = vsel %vm1314_vm4, %v1494_v38, -inf }
 0x340   : > { %1509 = vmax.xlane.f32.xlu1 %v1508_v42 }
 0x3b5   : > { %v1501_v43 = vpop.xlane.xlu1 %1500 }
 0x3b6   : > { %v1511_v44 = vsub.f32 %v1356_v16, %v1501_v43  ;;  %v1295_v16 = vadd.f32 %v3935_v13, %v5229_v10 }
 0x3b8   : > { %v1515_v45 = vmul.f32 1.442695, %v1511_v44  ;;  %v1550_v19 = vpack.c.bf16 %v1295_v16, %v1295_v16 }
 0x3ba   : > { %4744 = vpow2.f32 %v1515_v45  ;;  %v1743_v45 = vld [vmem:[%s5776_s8 + $0xc] sm:$0xf] }
 0x3bd   : > { %v1507_v46 = vpop.xlane.xlu0 %1506 }
 0x3be   : > { %v1513_v47 = vsub.f32 %v1448_v26, %v1507_v46  ;;  %v1694_v26 = vsel %vm1554_vm5, %v1550_v19, 0  ;;  %v3961_v19 = vld [vmem:[%s5777_s9] ss:$0 sm:$0xff] }
 0x3c0   : > { %v1519_v48 = vmul.f32 1.442695, %v1513_v47 }
 0x3c2   : > { %4746 = vpow2.f32 %v1519_v48 }
 0x3c4   : > { %v4745_v49 = vpop.eup %4744 }
 0x3c5   : > { %v1504_v50 = vpop.xlane.xlu1 %1503  ;;  %v1523_v52 = vsel %vm1314_vm4, %v4745_v49, 0.0 }
 0x3c6   : > { %v1512_v53 = vsub.f32 %v1402_v32, %v1504_v50  ;;  %1524 = vadd.xlane.f32.xlu0 %v1523_v52  ;;  %v1794_v32 = vsel %vm1554_vm5, %v1741_v31, 0 }
 0x3c8   : > { %v1517_v54 = vmul.f32 1.442695, %v1512_v53 }
 0x3ca   : > { %4748 = vpow2.f32 %v1517_v54 }
 0x3cc   : > { %v4747_v55 = vpop.eup %4746 }
 0x3cd   : > { %v1510_v56 = vpop.xlane.xlu1 %1509  ;;  %v1529_v57 = vsel %vm1314_vm4, %v4747_v55, 0.0 }
 0x3ce   : > { %v1514_v58 = vsub.f32 %v1494_v38, %v1510_v56  ;;  %1530 = vadd.xlane.f32.xlu0 %v1529_v57 }
 0x3d0   : > { %v1521_v59 = vmul.f32 1.442695, %v1514_v58 }
 0x3d2   : > { %4750 = vpow2.f32 %v1521_v59 }
 0x3d4   : > { %v4749_v60 = vpop.eup %4748 }
 0x3d5   : > { %v1526_v61 = vsel %vm1314_vm4, %v4749_v60, 0.0 }
 0x3d6   : > { %1527 = vadd.xlane.f32.xlu1 %v1526_v61 }
 0x3dc   : > { %v4751_v62 = vpop.eup %4750 }
 0x3dd   : > { %v1532_v63 = vsel %vm1314_vm4, %v4751_v62, 0.0 }
 0x3de   : > { %1533 = vadd.xlane.f32.xlu1 %v1532_v63 }
 0x453   : > { %v1525_v0 = vpop.xlane.xlu0 %1524 }
 0x454   : > { %4752 = vrcp.f32 %v1525_v0 }
 0x45b   : > { %v1531_v3 = vpop.xlane.xlu0 %1530 }
 0x45c   : > { %4754 = vrcp.f32 %v1531_v3 }
 0x45e   : > { %v4753_v4 = vpop.eup %4752 }
 0x45f   : > { %v1539_v6 = vmul.f32 %v4753_v4, %v4745_v49  ;;  %v1886_v49 = vsel %vm1554_vm5, %v1743_v45, 0 }
 0x461   : > { %v1543_v7 = vpack.c.bf16 %v1539_v6, %v1539_v6 }
 0x463   : > { %4386 = vmatmul.mubr.msk.bf16.vlgmr.msra.gmra.mrb[28].mxu0 %vm1314_vm4, %v1543_v7  ;;  %v1528_v11 = vpop.xlane.xlu1 %1527 }
 0x464   : > { %4396 = vmatpush3.bf16.msra.mxu0 %v1648_v8  ;;  %4756 = vrcp.f32 %v1528_v11  ;;  %4397 = vmatprep.mubr.msk.bf16.mxu0 %vm4863_vm1, %v4862_v9 }
 0x465   : > { %4407 = vmatprep.subr.bf16.mxu0 %v4862_v9 }
 0x466   : > { %v4755_v12 = vpop.eup %4754 }
 0x467   : > { %v1541_v51 = vmul.f32 %v4755_v12, %v4747_v55 }
 0x469   : > { %v1545_v15 = vpack.c.bf16 %v1541_v51, %v1541_v51 }
 0x46b   : > { %4398 = vmatmul.mubr.msk.bf16.vlgmr.msra.gmra.mrb[32].mxu0 %vm1314_vm4, %v1545_v15  ;;  %v1534_v17 = vpop.xlane.xlu1 %1533 }
 0x46c   : > { %4758 = vrcp.f32 %v1534_v17  ;;  %4409 = vmatprep.mubr.msk.bf16.mxu0 %vm4863_vm1, %v4862_v9  ;;  %4408 = vmatpush3.bf16.msra.mxu0 %v1748_v30 }
 0x46d   : > { %4419 = vmatprep.subr.bf16.mxu0 %v4862_v9 }
 0x46e   : > { %v4757_v18 = vpop.eup %4756 }
 0x46f   : > { %v1540_v20 = vmul.f32 %v4757_v18, %v4749_v60 }
 0x471   : > { %v1544_v24 = vpack.c.bf16 %v1540_v20, %v1540_v20  ;;  %v4796_v20 = vld [vmem:[%s5001_s25] sm:$0xff]  ;;  %s496_s25 = scalar_lea.vmem [#allocation2], %s3898_s20  ;;  %s4802_s20 = sshll.u32 %s4864_s22, 4  ;;  %s4803_s20 = int_to_ptr.vmem [resolvable:$false] %s4802_s20 }
 0x472   : > { %s3826_s16 = sshll.u32 %s496_s25, 4  ;;  %s5727_s16 = int_to_ptr.vmem [resolvable:$true] %s3826_s16 }
 0x473   : > { %4392 = vmatmul.mubr.msk.bf16.vlgmr.msra.gmra.mrb[36].mxu1 %vm1314_vm4, %v1544_v24  ;;  %s4798_s1 = scalar_lea.vmem %s5727_s16, 128  ;;  %p4805_p0 = scmp.lt.s32.totalorder %s5727_s16, %s4803_s20 }
 0x474   : > { %4402 = vmatpush3.bf16.msra.mxu1 %v1694_v26  ;;  %4403 = vmatprep.mubr.msk.bf16.mxu1 %vm4863_vm1, %v4862_v9  ;;  %p4799_p11 = scmp.ne.s32.totalorder %s5727_s16, %s4798_s1 }
 0x475   : > { %4413 = vmatprep.subr.bf16.mxu1 %v4862_v9 }
 0x476   : > { %v4759_v10 = vpop.eup %4758  ;;  %p4800_p12 = pnand %p4799_p11, %p4983_p5 }
 0x477   : > { %v1542_v27 = vmul.f32 %v4759_v10, %v4751_v62 }
 0x478   : > { %p4801_p13 = pneg %p4800_p12 }
 0x479   : > { %v1546_v28 = vpack.c.bf16 %v1542_v27, %v1542_v27 }
 0x47b   : > { %4404 = vmatmul.mubr.msk.bf16.vlgmr.msra.gmra.mrb[40].mxu1 %vm1314_vm4, %v1546_v28 }
 0x47c   : > { %4415 = vmatprep.mubr.msk.bf16.mxu1 %vm4863_vm1, %v4862_v9  ;;  %4414 = vmatpush3.bf16.msra.mxu1 %v1794_v32  ;;  %v4704_v32 = vld [vmem:[%s5778_s10] sm:$0xff]  }
 0x47d   : > { %4425 = vmatprep.subr.bf16.mxu1 %v4862_v9 }
 0x536   : > { %v1592_v34 = vpop.f32.mrb[28].mxu0 }
 0x537   : > { %v1736_v35 = vpack.c.bf16 %v1592_v34, %v1592_v34  ;;  %v4387_v36 = vpop.f32.mrb[29].mxu0  ;;  %v4706_v34 = vld [vmem:[%s5780_s12] sm:$0xff]  }
 0x538   : > { %v1595_v38 = vpop.f32.mrb[30].mxu0 }
 0x539   : > { %v4388_v39 = vpop.f32.mrb[31].mxu0  ;;  %4410 = vmatmul.mubr.msk.bf16.vlgmr.msra.gmra.mrb[36].mxu0 %vm1314_vm4, %v1736_v35  ;;  %v4707_v35 = vld [vmem:[%s5780_s12 + $0x8] sm:$0xff]  }
 0x53a   : > { %4420 = vmatpush3.bf16.msra.mxu0 %v1840_v37  ;;  %4421 = vmatprep.mubr.msk.bf16.mxu0 %vm4863_vm1, %v4862_v9 }
 0x53b   : > { %4431 = vmatprep.subr.bf16.mxu0 %v4862_v9 }
 0x53e   : > { %v1684_v40 = vpop.f32.mrb[32].mxu0 }
 0x53f   : > { %v1738_v41 = vpack.c.bf16 %v1684_v40, %v1684_v40  ;;  %v4399_v42 = vpop.f32.mrb[33].mxu0 }
 0x540   : > { %v1687_v43 = vpop.f32.mrb[34].mxu0 }
 0x541   : > { %v4400_v44 = vpop.f32.mrb[35].mxu0  ;;  %4422 = vmatmul.mubr.msk.bf16.vlgmr.msra.gmra.mrb[40].mxu0 %vm1314_vm4, %v1738_v41 }
 0x542   : > { %4435 = vmatprep.mubr.msk.bf16.mxu0 %vm4863_vm1, %v4862_v9  ;;  %4432 = vmatpush3.bf16.msra.mxu0 %v4704_v32  ;;  %v1965_v44 = vsub.s32 2, %v5028_v21 }
 0x543   : > { %4433 = vmatprep.subr.bf16.mxu0 %v4862_v9 }
 0x544   : > { %v1966_v45 = vrot.slane %v5034_v23, %v1965_v44 }
 0x546   : > { %v1638_v46 = vpop.f32.mrb[36].mxu1  ;;  %4434 = vmatpush3.bf16.msra.mxu0 %v4705_v33 }
 0x547   : > { %v1737_v47 = vpack.c.bf16 %v1638_v46, %v1638_v46  ;;  %v4393_v48 = vpop.f32.mrb[37].mxu1  ;;  %4451 = vmatprep.subr.bf16.mxu0 %v4862_v9  ;;  %v1971_v46 = vsub.s32 3, %v5028_v21 }
 0x548   : > { %v1641_v50 = vpop.f32.mrb[38].mxu1 }
 0x549   : > { %v4394_v52 = vpop.f32.mrb[39].mxu1  ;;  %4416 = vmatmul.mubr.msk.bf16.vlgmr.msra.gmra.mrb[44].mxu1 %vm1314_vm4, %v1737_v47 }
 0x54a   : > { %4426 = vmatpush3.bf16.msra.mxu1 %v1886_v49  ;;  %4427 = vmatprep.mubr.msk.bf16.mxu1 %vm4863_vm1, %v4862_v9  ;;  %v1972_v49 = vrot.slane %v5034_v23, %v1971_v46 }
 0x54b   : > { %4439 = vmatprep.subr.bf16.mxu1 %v4862_v9 }
 0x54e   : > { %v1730_v53 = vpop.f32.mrb[40].mxu1 }
 0x54f   : > { %v1739_v54 = vpack.c.bf16 %v1730_v53, %v1730_v53  ;;  %v4405_v55 = vpop.f32.mrb[41].mxu1 }
 0x550   : > { %v1733_v56 = vpop.f32.mrb[42].mxu1  ;;  %v4709_v55 = vld [vmem:[%s5780_s12 + $0x18] sm:$0xff]  }
 0x551   : > { %v4406_v57 = vpop.f32.mrb[43].mxu1  ;;  %4428 = vmatmul.mubr.msk.bf16.vlgmr.msra.gmra.mrb[48].mxu1 %vm1314_vm4, %v1739_v54  ;;  %v4708_v54 = vld [vmem:[%s5780_s12 + $0x10] sm:$0xff]   ;;  %v3962_v56 = vld [vmem:[%s5779_s11] ss:$0 sm:$0xff] }
 0x552   : > { %4447 = vmatprep.mubr.msk.bf16.mxu1 %vm4863_vm1, %v4862_v9  ;;  %4440 = vmatpush3.bf16.msra.mxu1 %v4706_v34 }
 0x553   : > { %4441 = vmatprep.subr.bf16.mxu1 %v4862_v9 }
 0x556   : > { %4442 = vmatpush3.bf16.msra.mxu1 %v4707_v35 }
 0x557   : > { %4443 = vmatprep.subr.bf16.mxu1 %v4862_v9 }
 0x55a   : > { %4444 = vmatpush3.bf16.msra.mxu1 %v4708_v54  ;;  %v5402_v54 = vld [vmem:[%s5782_s14 + $0x8] sm:$0x3f] }
 0x55b   : > { %4445 = vmatprep.subr.bf16.mxu1 %v4862_v9 }
 0x55e   : > { %4446 = vmatpush3.bf16.msra.mxu1 %v4709_v55  ;;  %v2182_v55 = vrot.slane %v5402_v54, %v531_v22  ;;  %v4716_v22 = vld [vmem:[%s5793_s2 + $0x58] sm:$0xff]  }
 0x55f   : > { %4467 = vmatprep.subr.bf16.mxu1 %v4862_v9 }
 0x60c   : > { %v1784_v58 = vpop.f32.mrb[36].mxu0 }
 0x60d   : > { %v4411_v59 = vpop.f32.mrb[37].mxu0  ;;  %v1928_v3 = vsel %vm508_vm0, %v1784_v58, 0.0 }
 0x60e   : > { %v1787_v60 = vpop.f32.mrb[38].mxu0 }
 0x60f   : > { %v4412_v61 = vpop.f32.mrb[39].mxu0 }
 0x614   : > { %v1876_v62 = vpop.f32.mrb[40].mxu0 }
 0x615   : > { %v4423_v63 = vpop.f32.mrb[41].mxu0  ;;  %v1931_v8 = vsel %vm508_vm0, %v1876_v62, 0.0 }
 0x616   : > { %v1879_v0 = vpop.f32.mrb[42].mxu0 }
 0x617   : > { %v4424_v1 = vpop.f32.mrb[43].mxu0 }
 0x618   : > { %v3971_v1 = vld [vmem:[%s5781_s13] ss:$0 sm:$0xff] }
 0x61c   : > { %v1830_v2 = vpop.f32.mrb[44].mxu1 }
 0x61d   : > { %v1929_v4 = vsel %vm508_vm0, %v1830_v2, 0.0  ;;  %v4417_v5 = vpop.f32.mrb[45].mxu1 }
 0x61e   : > { %v1930_v6 = vadd.f32 %v1929_v4, %v1928_v3  ;;  %v1833_v7 = vpop.f32.mrb[46].mxu1 }
 0x61f   : > { %v4418_v11 = vpop.f32.mrb[47].mxu1 }
 0x620   : > { %v1932_v12 = vadd.f32 %v1931_v8, %v1930_v6 }
 0x624   : > { %v1922_v51 = vpop.f32.mrb[48].mxu1 }
 0x625   : > { %v1933_v13 = vsel %vm508_vm0, %v1922_v51, 0.0  ;;  %v4429_v15 = vpop.f32.mrb[49].mxu1 }
 0x626   : > { %v1934_v16 = vadd.f32 %v1933_v13, %v1932_v12  ;;  %v1925_v17 = vpop.f32.mrb[50].mxu1 }
 0x627   : > { %v4430_v18 = vpop.f32.mrb[51].mxu1 }
 0x628   : > { %v1935_v24 = vadd.f32 %v4796_v20, %v1934_v16 }
 0x62a   : > { %v5316_v26 = vadd.f32 %v3961_v19, %v1935_v24 }
 0x62c   : > { %v1944_v10 = vsel %vm508_vm0, %v5316_v26, 0.0 }
 0x62d   : > { %1945 = vadd.xlane.f32.xlu0 %v1944_v10  ;;  %v2149_v10 = vsub.s32 4, %v5028_v21 }
 0x6ba   : > { %v1946_v27 = vpop.xlane.xlu0 %1945 }
 0x6bb   : > { %v1947_v28 = vmul.f32 0.03125, %v1946_v27  ;;  %v2150_v27 = vrot.slane %v5034_v23, %v2149_v10 }
 0x6bd   : > { %v1948_v29 = vsub.f32 %v5316_v26, %v1947_v28  ;;  %v2155_v28 = vsub.s32 5, %v5028_v21 }
 0x6bf   : > { %v1949_v30 = vmul.f32 %v1948_v29, %v1948_v29 }
 0x6c1   : > { %v1950_v31 = vsel %vm508_vm0, %v1949_v30, 0.0 }
 0x6c2   : > { %1951 = vadd.xlane.f32.xlu1 %v1950_v31  ;;  %v2156_v31 = vrot.slane %v5034_v23, %v2155_v28  ;;  %v4711_v23 = vld [vmem:[%s5793_s2 + $0x60] sm:$0xff]  }
 0x74f   : > { %v1952_v36 = vpop.xlane.xlu1 %1951 }
 0x750   : > { %v1953_v37 = vmul.f32 0.032258064, %v1952_v36 }
 0x752   : > { %4760 = vrsqrt.f32 %v1953_v37  ;;  %vm1956_vm6 = vcmp.eq.f32.partialorder %v1953_v37, inf  ;;  %v1959_v40 = vand.u32 2147483648, %v1953_v37  ;;  %vm1958_vm7 = vcmp.eq.f32.partialorder %v1953_v37, 0.0 }
 0x75c   : > { %v4761_v38 = vpop.eup %4760 }
 0x75d   : > { %v1955_v39 = vmul.f32 %v4761_v38, %v1953_v37 }
 0x75f   : > { %v1957_v41 = vsel %vm1956_vm6, %v1953_v37, %v1955_v39 }
 0x760   : > { %v1960_v42 = vsel %vm1958_vm7, %v1959_v40, %v1957_v41  ;;  %v4710_v40 = vld [vmem:[%s5793_s2 + $0x40] sm:$0xff]   ;;  %v4712_v41 = vld [vmem:[%s5793_s2 + $0x48] sm:$0xff]  }
 0x761   : > { %v1961_v43 = vadd.f32 1e-06, %v1960_v42  ;;  %v4713_v42 = vld [vmem:[%s5793_s2 + $0x68] sm:$0xff]  }
 0x763   : > { %4762 = vrcp.f32 %v1961_v43 }
 0x76d   : > { %v4763_v47 = vpop.eup %4762 }
 0x76e   : > { %v1967_v48 = vmul.f32 %v4763_v47, %v1966_v45 }
 0x770   : > { %v1968_v50 = vmul.f32 %v1967_v48, %v1948_v29 }
 0x772   : > { %v1973_v52 = vadd.f32 %v1972_v49, %v1968_v50 }
 0x774   : > { %v1974_v53 = vpack.c.bf16 %v1973_v52, %v1973_v52 }
 0x776   : > { %4436 = vmatmul.mubr.msk.bf16.vlgmr.msra.gmra.mrb[44].mxu0 %vm508_vm0, %v1974_v53 }
 0x777   : > { %4455 = vmatprep.mubr.msk.bf16.mxu0 %vm4863_vm1, %v4862_v9  ;;  %4452 = vmatpush3.bf16.msra.mxu0 %v4710_v40 }
 0x778   : > { %4453 = vmatprep.subr.bf16.mxu0 %v4862_v9 }
 0x77b   : > { %4454 = vmatpush3.bf16.msra.mxu0 %v4712_v41 }
 0x77c   : > { %4459 = vmatprep.subr.bf16.mxu0 %v4862_v9 }
 0x849   : > { %v2035_v57 = vpop.f32.mrb[44].mxu0 }
 0x84a   : > { %v2036_v58 = vadd.f32 %v3962_v56, %v2035_v57  ;;  %v4437_v59 = vpop.f32.mrb[45].mxu0  ;;  %v2188_v57 = vrot.slane %v5402_v54, %v537_v25  ;;  %v4717_v25 = vld [vmem:[%s5771_s3 + $0x48] sm:$0xff]  }
 0x84b   : > { %v2038_v60 = vpop.f32.mrb[46].mxu0 }
 0x84c   : > { %v2041_v61 = vmax.f32 %v2036_v58, 0.0  ;;  %v4438_v62 = vpop.f32.mrb[47].mxu0 }
 0x84d   : > { %v4715_v62 = vld [vmem:[%s5771_s3 + $0x40] sm:$0xff]  }
 0x84e   : > { %v2042_v63 = vpack.c.bf16 %v2041_v61, %v2041_v61  ;;  %v4714_v61 = vld [vmem:[%s5793_s2 + $0x50] sm:$0xff]  }
 0x850   : > { %4448 = vmatmul.mubr.msk.bf16.vlgmr.msra.gmra.mrb[52].mxu1 %vm2075_vm8, %v2042_v63 }
 0x851   : > { %4471 = vmatprep.mubr.msk.bf16.mxu1 %vm4863_vm1, %v4862_v9  ;;  %4468 = vmatpush3.bf16.msra.mxu1 %v4711_v23 }
 0x852   : > { %4469 = vmatprep.subr.bf16.mxu1 %v4862_v9 }
 0x855   : > { %4470 = vmatpush3.bf16.msra.mxu1 %v4713_v42  ;;  %v3993_v42 = vld [vmem:[%s5773_s5 + $0x4] ss:$0 sm:$0xff] }
 0x856   : > { %4483 = vmatprep.subr.bf16.mxu1 %v4862_v9 }
 0x923   : > { %v2113_v0 = vpop.f32.mrb[52].mxu1 }
 0x924   : > { %v2119_v2 = vadd.f32 %v2113_v0, %v5316_v26  ;;  %v4449_v3 = vpop.f32.mrb[53].mxu1  ;;  %v4718_v0 = vld [vmem:[%s5793_s2 + $0x70] sm:$0xff]  }
 0x925   : > { %v2116_v4 = vpop.f32.mrb[54].mxu1  ;;  %v4721_v3 = vld [vmem:[%s5771_s3 + $0x68] sm:$0xff]  }
 0x926   : > { %v4450_v5 = vpop.f32.mrb[55].mxu1  ;;  %v2127_v6 = vadd.f32 %v3971_v1, %v2119_v2  ;;  %v4719_v1 = vld [vmem:[%s5771_s3 + $0x60] sm:$0xff]   ;;  %v4720_v2 = vld [vmem:[%s5793_s2 + $0x78] sm:$0xff]   ;;  %v4722_v4 = vld [vmem:[%s5771_s3 + $0x50] sm:$0xff]   ;;  %s4804_s2 = scalar_lea.vmem %s4803_s20, 256 }
 0x927   : > { %v4723_v5 = vld [vmem:[%s5772_s4 + $0x40] sm:$0xff]   ;;  %p4806_p1 = scmp.lt.s32.totalorder %s4804_s2, %s4798_s1 }
 0x928   : > { %v2128_v7 = vsel %vm508_vm0, %v2127_v6, 0.0 }
 0x929   : > { %2129 = vadd.xlane.f32.xlu0 %v2128_v7  ;;  %v4725_v7 = vld [vmem:[%s5772_s4 + $0x48] sm:$0xff]   ;;  %p4807_p2 = por %p4806_p1, %p4805_p0 }
 0x92b   : > { %p4808_p3 = pnand %p4807_p2, %p4801_p13 }
 0x9b6   : > { %v2130_v8 = vpop.xlane.xlu0 %2129 }
 0x9b7   : > { %v2131_v11 = vmul.f32 0.03125, %v2130_v8  ;;  %v4726_v8 = vld [vmem:[%s5771_s3 + $0x70] sm:$0xff]  }
 0x9b9   : > { %v2132_v12 = vsub.f32 %v2127_v6, %v2131_v11  ;;  %v4724_v6 = vld [vmem:[%s5771_s3 + $0x58] sm:$0xff]   ;;  %v4727_v11 = vld [vmem:[%s5772_s4 + $0x60] sm:$0xff]  }
 0x9bb   : > { %v2133_v51 = vmul.f32 %v2132_v12, %v2132_v12 }
 0x9bd   : > { %v2134_v13 = vsel %vm508_vm0, %v2133_v51, 0.0  ;;  %v4729_v51 = vld [vmem:[%s5772_s4 + $0x68] sm:$0xff]  }
 0x9be   : > { %2135 = vadd.xlane.f32.xlu1 %v2134_v13  ;;  %v4730_v13 = vld [vmem:[%s5772_s4 + $0x50] sm:$0xff]  }
 0xa4b   : > { %v2136_v15 = vpop.xlane.xlu1 %2135 }
 0xa4c   : > { %v2137_v16 = vmul.f32 0.032258064, %v2136_v15  ;;  %v4731_v15 = vld [vmem:[%s5772_s4 + $0x58] sm:$0xff]  }
 0xa4e   : > { %4764 = vrsqrt.f32 %v2137_v16  ;;  %vm2140_vm9 = vcmp.eq.f32.partialorder %v2137_v16, inf  ;;  %v2143_v19 = vand.u32 2147483648, %v2137_v16  ;;  %vm2142_vm10 = vcmp.eq.f32.partialorder %v2137_v16, 0.0 }
 0xa58   : > { %v4765_v17 = vpop.eup %4764 }
 0xa59   : > { %v2139_v18 = vmul.f32 %v4765_v17, %v2137_v16  ;;  %v4733_v17 = vld [vmem:[%s5772_s4 + $0x78] sm:$0xff]  }
 0xa5b   : > { %v2141_v20 = vsel %vm2140_vm9, %v2137_v16, %v2139_v18  ;;  %v4732_v16 = vld [vmem:[%s5772_s4 + $0x70] sm:$0xff]  }
 0xa5c   : > { %v2144_v24 = vsel %vm2142_vm10, %v2143_v19, %v2141_v20 }
 0xa5d   : > { %v2145_v26 = vadd.f32 1e-06, %v2144_v24 }
 0xa5f   : > { %4766 = vrcp.f32 %v2145_v26 }
 0xa69   : > { %v4767_v29 = vpop.eup %4766 }
 0xa6a   : > { %v2151_v30 = vmul.f32 %v4767_v29, %v2150_v27 }
 0xa6c   : > { %v2152_v32 = vmul.f32 %v2151_v30, %v2132_v12  ;;  %v4728_v12 = vld [vmem:[%s5771_s3 + $0x78] sm:$0xff]  }
 0xa6e   : > { %v5377_v33 = vadd.f32 %v2156_v31, %v2152_v32  ;;  %v4029_v31 = vld [vmem:[%s5774_s6 + $0x4] ss:$0 sm:$0xff] }
 0xa70   : > { %v2160_v34 = vsel %vm508_vm0, %v5377_v33, 0.0 }
 0xa71   : > { %2161 = vadd.xlane.f32.xlu0 %v2160_v34 }
 0xafe   : > { %v2162_v35 = vpop.xlane.xlu0 %2161 }
 0xaff   : > { %v2163_v36 = vmul.f32 0.03125, %v2162_v35 }
 0xb01   : > { %v2164_v37 = vsub.f32 %v5377_v33, %v2163_v36 }
 0xb03   : > { %v2165_v38 = vmul.f32 %v2164_v37, %v2164_v37 }
 0xb05   : > { %v2166_v39 = vsel %vm508_vm0, %v2165_v38, 0.0 }
 0xb06   : > { %2167 = vadd.xlane.f32.xlu1 %v2166_v39 }
 0xb93   : > { %v2168_v43 = vpop.xlane.xlu1 %2167 }
 0xb94   : > { %v2169_v45 = vmul.f32 0.032258064, %v2168_v43 }
 0xb96   : > { %4768 = vrsqrt.f32 %v2169_v45  ;;  %vm2172_vm11 = vcmp.eq.f32.partialorder %v2169_v45, inf  ;;  %v2175_v49 = vand.u32 2147483648, %v2169_v45  ;;  %vm2174_vm12 = vcmp.eq.f32.partialorder %v2169_v45, 0.0 }
 0xba0   : > { %v4769_v47 = vpop.eup %4768 }
 0xba1   : > { %v2171_v48 = vmul.f32 %v4769_v47, %v2169_v45 }
 0xba3   : > { %v2173_v50 = vsel %vm2172_vm11, %v2169_v45, %v2171_v48  ;;  %v4031_v45 = vld [vmem:[%s5774_s6 + $0x6] ss:$0 sm:$0xff] }
 0xba4   : > { %v2176_v52 = vsel %vm2174_vm12, %v2175_v49, %v2173_v50 }
 0xba5   : > { %v2177_v53 = vadd.f32 1e-06, %v2176_v52 }
 0xba7   : > { %4770 = vrcp.f32 %v2177_v53 }
 0xbb1   : > { %v4771_v56 = vpop.eup %4770 }
 0xbb2   : > { %v2183_v58 = vmul.f32 %v4771_v56, %v2182_v55 }
 0xbb4   : > { %v2184_v59 = vmul.f32 %v2183_v58, %v2164_v37 }
 0xbb6   : > { %v2189_v60 = vadd.f32 %v2188_v57, %v2184_v59 }
 0xbb8   : > { %v5416_v63 = vpack.c.bf16 %v2189_v60, %v2189_v60 }
 0xbba   : > { %4456 = vmatmul.mubr.msk.bf16.vlgmr.msra.gmra.mrb[48].mxu0 %vm508_vm0, %v5416_v63  ;;  %4472 = vmatmul.mubr.msk.bf16.vlgmr.msra.gmra.mrb[56].mxu1 %vm508_vm0, %v5416_v63 }
 0xbbb   : > { %4460 = vmatpush3.bf16.msra.mxu0 %v4714_v61  ;;  %4484 = vmatpush3.bf16.msra.mxu1 %v4715_v62  ;;  %v3995_v61 = vld [vmem:[%s5773_s5 + $0x6] ss:$0 sm:$0xff] }
 0xbbc   : > { %4461 = vmatprep.subr.bf16.mxu0 %v4862_v9  ;;  %4485 = vmatprep.subr.bf16.mxu1 %v4862_v9 }
 0xbbd   : > { %4463 = vmatprep.mubr.msk.bf16.mxu0 %vm4863_vm1, %v4862_v9  ;;  %4487 = vmatprep.mubr.msk.bf16.mxu1 %vm4863_vm1, %v4862_v9 }
 0xbbf   : > { %4462 = vmatpush3.bf16.msra.mxu0 %v4716_v22  ;;  %4486 = vmatpush3.bf16.msra.mxu1 %v4717_v25  ;;  %v4065_v22 = vld [vmem:[%s5775_s7 + $0x4] ss:$0 sm:$0xff] }
 0xbc0   : > { %4475 = vmatprep.subr.bf16.mxu0 %v4862_v9  ;;  %4499 = vmatprep.subr.bf16.mxu1 %v4862_v9 }
 0xbc2   : > { %4464 = vmatmul.mubr.msk.bf16.vlgmr.msra.gmra.mrb[52].mxu0 %vm508_vm0, %v5416_v63  ;;  %4488 = vmatmul.mubr.msk.bf16.vlgmr.msra.gmra.mrb[60].mxu1 %vm508_vm0, %v5416_v63 }
 0xbc3   : > { %4476 = vmatpush3.bf16.msra.mxu0 %v4718_v0  ;;  %4500 = vmatpush3.bf16.msra.mxu1 %v4719_v1 }
 0xbc4   : > { %4477 = vmatprep.subr.bf16.mxu0 %v4862_v9  ;;  %4501 = vmatprep.subr.bf16.mxu1 %v4862_v9 }
 0xbc5   : > { %4479 = vmatprep.mubr.msk.bf16.mxu0 %vm4863_vm1, %v4862_v9  ;;  %4503 = vmatprep.mubr.msk.bf16.mxu1 %vm4863_vm1, %v4862_v9 }
 0xbc7   : > { %4478 = vmatpush3.bf16.msra.mxu0 %v4720_v2  ;;  %4502 = vmatpush3.bf16.msra.mxu1 %v4721_v3 }
 0xbc8   : > { %4491 = vmatprep.subr.bf16.mxu0 %v4862_v9  ;;  %4515 = vmatprep.subr.bf16.mxu1 %v4862_v9 }
 0xbca   : > { %4480 = vmatmul.mubr.msk.bf16.vlgmr.msra.gmra.mrb[56].mxu0 %vm508_vm0, %v5416_v63  ;;  %4504 = vmatmul.mubr.msk.bf16.vlgmr.msra.gmra.mrb[64].mxu1 %vm508_vm0, %v5416_v63 }
 0xbcb   : > { %4492 = vmatpush3.bf16.msra.mxu0 %v4722_v4  ;;  %4516 = vmatpush3.bf16.msra.mxu1 %v4723_v5 }
 0xbcc   : > { %4493 = vmatprep.subr.bf16.mxu0 %v4862_v9  ;;  %4517 = vmatprep.subr.bf16.mxu1 %v4862_v9 }
 0xbcd   : > { %4495 = vmatprep.mubr.msk.bf16.mxu0 %vm4863_vm1, %v4862_v9  ;;  %4519 = vmatprep.mubr.msk.bf16.mxu1 %vm4863_vm1, %v4862_v9 }
 0xbcf   : > { %4494 = vmatpush3.bf16.msra.mxu0 %v4724_v6  ;;  %4518 = vmatpush3.bf16.msra.mxu1 %v4725_v7 }
 0xbd0   : > { %4507 = vmatprep.subr.bf16.mxu0 %v4862_v9  ;;  %4531 = vmatprep.subr.bf16.mxu1 %v4862_v9 }
 0xbd2   : > { %4496 = vmatmul.mubr.msk.bf16.vlgmr.msra.gmra.mrb[60].mxu0 %vm508_vm0, %v5416_v63  ;;  %4520 = vmatmul.mubr.msk.bf16.vlgmr.msra.gmra.mrb[68].mxu1 %vm508_vm0, %v5416_v63 }
 0xbd3   : > { %4508 = vmatpush3.bf16.msra.mxu0 %v4726_v8  ;;  %4532 = vmatpush3.bf16.msra.mxu1 %v4727_v11 }
 0xbd4   : > { %4509 = vmatprep.subr.bf16.mxu0 %v4862_v9  ;;  %4533 = vmatprep.subr.bf16.mxu1 %v4862_v9 }
 0xbd5   : > { %4511 = vmatprep.mubr.msk.bf16.mxu0 %vm4863_vm1, %v4862_v9  ;;  %4535 = vmatprep.mubr.msk.bf16.mxu1 %vm4863_vm1, %v4862_v9 }
 0xbd7   : > { %4510 = vmatpush3.bf16.msra.mxu0 %v4728_v12  ;;  %4534 = vmatpush3.bf16.msra.mxu1 %v4729_v51 }
 0xbd8   : > { %4523 = vmatprep.subr.bf16.mxu0 %v4862_v9  ;;  %4547 = vmatprep.subr.bf16.mxu1 %v4862_v9 }
 0xbda   : > { %4512 = vmatmul.mubr.msk.bf16.vlgmr.msra.gmra.mrb[64].mxu0 %vm508_vm0, %v5416_v63  ;;  %4536 = vmatmul.mubr.msk.bf16.vlgmr.msra.gmra.mrb[72].mxu1 %vm508_vm0, %v5416_v63 }
 0xbdb   : > { %4524 = vmatpush3.bf16.msra.mxu0 %v4730_v13  ;;  %4527 = vmatprep.mubr.msk.bf16.mxu0 %vm4863_vm1, %v4862_v9 }
 0xbdc   : > { %4525 = vmatprep.subr.bf16.mxu0 %v4862_v9  ;;  %4549 = vmatprep.mubr.msk.bf16.mxu1 %vm4863_vm1, %v4862_v9 }
 0xbdf   : > { %4526 = vmatpush3.bf16.msra.mxu0 %v4731_v15  ;;  %v3994_v15 = vld [vmem:[%s5773_s5 + $0x5] ss:$0 sm:$0xff] }
 0xbe0   : > { %4539 = vmatprep.subr.bf16.mxu0 %v4862_v9 }
 0xbe2   : > { %4528 = vmatmul.mubr.msk.bf16.vlgmr.msra.gmra.mrb[68].mxu0 %vm508_vm0, %v5416_v63 }
 0xbe3   : > { %4540 = vmatpush3.bf16.msra.mxu0 %v4732_v16  ;;  %4543 = vmatprep.mubr.msk.bf16.mxu0 %vm4863_vm1, %v4862_v9 }
 0xbe4   : > { %4541 = vmatprep.subr.bf16.mxu0 %v4862_v9 }
 0xbe7   : > { %4542 = vmatpush3.bf16.msra.mxu0 %v4733_v17 }
 0xbe8   : > { %4553 = vmatprep.subr.bf16.mxu0 %v4862_v9 }
 0xbea   : > { %4544 = vmatmul.mubr.msk.bf16.vlgmr.msra.gmra.mrb[72].mxu0 %vm508_vm0, %v5416_v63  ;;  %v4030_v63 = vld [vmem:[%s5774_s6 + $0x5] ss:$0 sm:$0xff] }
 0xbeb   : > { %4555 = vmatprep.mubr.msk.bf16.mxu0 %vm4863_vm1, %v4862_v9 }
 0xc8d   : > { %v2286_v18 = vpop.f32.mrb[48].mxu0  ;;  %v2390_v19 = vpop.f32.mrb[56].mxu1 }
 0xc8e   : > { %v4457_v20 = vpop.f32.mrb[49].mxu0  ;;  %v4473_v24 = vpop.f32.mrb[57].mxu1  ;;  %v2287_v47 = vadd.f32 %v3993_v42, %v2286_v18  ;;  %v2391_v25 = vadd.f32 %v3995_v61, %v2390_v19  ;;  %v4032_v18 = vld [vmem:[%s5774_s6 + $0x7] ss:$0 sm:$0xff] }
 0xc8f   : > { %v2289_v26 = vpop.f32.mrb[50].mxu0  ;;  %v2393_v27 = vpop.f32.mrb[58].mxu1 }
 0xc90   : > { %v4458_v29 = vpop.f32.mrb[51].mxu0  ;;  %v4474_v30 = vpop.f32.mrb[59].mxu1  ;;  %v2956_v57 = vpack.c.bf16 %v2287_v47, %v2287_v47  ;;  %v2958_v8 = vpack.c.bf16 %v2391_v25, %v2391_v25 }
 0xc95   : > { %v2338_v32 = vpop.f32.mrb[52].mxu0  ;;  %v2540_v34 = vpop.f32.mrb[60].mxu1 }
 0xc96   : > { %v2541_v35 = vadd.f32 %v4029_v31, %v2540_v34  ;;  %v4465_v36 = vpop.f32.mrb[53].mxu0  ;;  %v4489_v37 = vpop.f32.mrb[61].mxu1  ;;  %v2339_v19 = vadd.f32 %v3994_v15, %v2338_v32  ;;  %v3996_v32 = vld [vmem:[%s5773_s5 + $0x7] ss:$0 sm:$0xff] }
 0xc97   : > { %v2341_v38 = vpop.f32.mrb[54].mxu0  ;;  %v2543_v39 = vpop.f32.mrb[62].mxu1 }
 0xc98   : > { %v2960_v40 = vpack.c.bf16 %v2541_v35, %v2541_v35  ;;  %v4466_v23 = vpop.f32.mrb[55].mxu0  ;;  %v4490_v41 = vpop.f32.mrb[63].mxu1  ;;  %v2957_v34 = vpack.c.bf16 %v2339_v19, %v2339_v19  ;;  %v4066_v39 = vld [vmem:[%s5775_s7 + $0x5] ss:$0 sm:$0xff] }
 0xc9a   : > { %v2968_v43 = vsel %vm1314_vm4, %v2960_v40, 0 }
 0xc9b   : > { %4548 = vmatpush3.bf16.xpose.msra.mxu1 %v2968_v43 }
 0xc9c   : > { %4559 = vmatprep.subr.bf16.mxu1 %v4862_v9 }
 0xc9d   : > { %v2442_v48 = vpop.f32.mrb[56].mxu0  ;;  %v2644_v49 = vpop.f32.mrb[64].mxu1 }
 0xc9e   : > { %v2645_v50 = vadd.f32 %v4031_v45, %v2644_v49  ;;  %v4481_v52 = vpop.f32.mrb[57].mxu0  ;;  %v4505_v53 = vpop.f32.mrb[65].mxu1  ;;  %v2443_v40 = vadd.f32 %v3996_v32, %v2442_v48 }
 0xc9f   : > { %v2445_v55 = vpop.f32.mrb[58].mxu0  ;;  %v2647_v56 = vpop.f32.mrb[66].mxu1 }
 0xca0   : > { %v2962_v58 = vpack.c.bf16 %v2645_v50, %v2645_v50  ;;  %v4482_v59 = vpop.f32.mrb[59].mxu0  ;;  %v4506_v60 = vpop.f32.mrb[67].mxu1  ;;  %v2959_v45 = vpack.c.bf16 %v2443_v40, %v2443_v40 }
 0xca2   : > { %v3060_v62 = vsel %vm1314_vm4, %v2962_v58, 0  ;;  %4550 = vmatmul.mubr.msk.bf16.vlgmr.msra.gmra.mrb[76].mxu1 %vm1314_vm4, %v2956_v57 }
 0xca3   : > { %4560 = vmatpush3.bf16.xpose.msra.mxu1 %v3060_v62  ;;  %4561 = vmatprep.mubr.msk.bf16.mxu1 %vm4863_vm1, %v4862_v9 }
 0xca4   : > { %4571 = vmatprep.subr.bf16.mxu1 %v4862_v9 }
 0xca5   : > { %v2592_v0 = vpop.f32.mrb[60].mxu0  ;;  %v2794_v1 = vpop.f32.mrb[68].mxu1 }
 0xca6   : > { %v2593_v2 = vadd.f32 %v4030_v63, %v2592_v0  ;;  %v2795_v3 = vadd.f32 %v4065_v22, %v2794_v1  ;;  %v4497_v4 = vpop.f32.mrb[61].mxu0  ;;  %v4521_v5 = vpop.f32.mrb[69].mxu1 }
 0xca7   : > { %v2595_v6 = vpop.f32.mrb[62].mxu0  ;;  %v2797_v7 = vpop.f32.mrb[70].mxu1 }
 0xca8   : > { %v2961_v11 = vpack.c.bf16 %v2593_v2, %v2593_v2  ;;  %v3196_v12 = vpack.c.bf16 %v2795_v3, %v2795_v3  ;;  %v4498_v51 = vpop.f32.mrb[63].mxu0  ;;  %v4522_v13 = vpop.f32.mrb[71].mxu1 }
 0xcaa   : > { %v3014_v16 = vsel %vm1314_vm4, %v2961_v11, 0  ;;  %v3204_v17 = vsel %vm1554_vm5, %v3196_v12, 0  ;;  %4562 = vmatmul.mubr.msk.bf16.vlgmr.msra.gmra.mrb[80].mxu1 %vm1314_vm4, %v2958_v8  ;;  %v4797_v11 = vld [vmem:[%s5235_s27] ss:$0 sm:$0xff] }
 0xcab   : > { %4554 = vmatpush3.bf16.xpose.msra.mxu0 %v3014_v16  ;;  %4572 = vmatpush3.bf16.msra.mxu1 %v3204_v17 }
 0xcac   : > { %4565 = vmatprep.subr.bf16.mxu0 %v4862_v9  ;;  %4573 = vmatprep.mubr.msk.bf16.mxu1 %vm4863_vm1, %v4862_v9 }
 0xcad   : > { %v2696_v20 = vpop.f32.mrb[64].mxu0  ;;  %v5577_v24 = vpop.f32.mrb[72].mxu1  ;;  %4583 = vmatprep.subr.bf16.mxu1 %v4862_v9 }
 0xcae   : > { %v2697_v26 = vadd.f32 %v4032_v18, %v2696_v20  ;;  %v4513_v27 = vpop.f32.mrb[65].mxu0  ;;  %v4537_v29 = vpop.f32.mrb[73].mxu1 }
 0xcaf   : > { %v2699_v30 = vpop.f32.mrb[66].mxu0  ;;  %v2901_v31 = vpop.f32.mrb[74].mxu1 }
 0xcb0   : > { %v2963_v35 = vpack.c.bf16 %v2697_v26, %v2697_v26  ;;  %v4514_v36 = vpop.f32.mrb[67].mxu0  ;;  %v4538_v37 = vpop.f32.mrb[75].mxu1 }
 0xcb2   : > { %v3106_v38 = vsel %vm1314_vm4, %v2963_v35, 0  ;;  %4556 = vmatmul.mubr.msk.bf16.vlgmr.msra.gmra.mrb[76].mxu0 %vm1314_vm4, %v2957_v34 }
 0xcb3   : > { %4566 = vmatpush3.bf16.xpose.msra.mxu0 %v3106_v38  ;;  %4567 = vmatprep.mubr.msk.bf16.mxu0 %vm4863_vm1, %v4862_v9 }
 0xcb4   : > { %4577 = vmatprep.subr.bf16.mxu0 %v4862_v9 }
 0xcb5   : > { %v2846_v23 = vpop.f32.mrb[68].mxu0 }
 0xcb6   : > { %v2847_v41 = vadd.f32 %v4066_v39, %v2846_v23  ;;  %v4529_v42 = vpop.f32.mrb[69].mxu0 }
 0xcb7   : > { %v2849_v43 = vpop.f32.mrb[70].mxu0 }
 0xcb8   : > { %v3197_v47 = vpack.c.bf16 %v2847_v41, %v2847_v41  ;;  %v4530_v49 = vpop.f32.mrb[71].mxu0  ;;  %v4067_v43 = vld [vmem:[%s5775_s7 + $0x6] ss:$0 sm:$0xff] }
 0xcba   : > { %v3250_v50 = vsel %vm1554_vm5, %v3197_v47, 0  ;;  %4568 = vmatmul.mubr.msk.bf16.vlgmr.msra.gmra.mrb[80].mxu0 %vm1314_vm4, %v2959_v45  ;;  %v2899_v45 = vadd.f32 %v4067_v43, %v5577_v24 }
 0xcbb   : > { %4578 = vmatpush3.bf16.msra.mxu0 %v3250_v50  ;;  %4579 = vmatprep.mubr.msk.bf16.mxu0 %vm4863_vm1, %v4862_v9 }
 0xcbc   : > { %4589 = vmatprep.subr.bf16.mxu0 %v4862_v9  ;;  %v3198_v50 = vpack.c.bf16 %v2899_v45, %v2899_v45 }
 0xcbd   : > { %v5596_v48 = vpop.f32.mrb[72].mxu0 }
 0xcbe   : > { %v4545_v52 = vpop.f32.mrb[73].mxu0 }
 0xcbf   : > { %v2953_v53 = vpop.f32.mrb[74].mxu0 }
 0xcc0   : > { %v4546_v55 = vpop.f32.mrb[75].mxu0 }
 0xcc1   : > { %v3296_v55 = vsel %vm1554_vm5, %v3198_v50, 0 }
 0xd75   : > { %v3004_v56 = vpop.f32.mrb[76].mxu1 }
 0xd76   : > { %v3005_v57 = vadd.f32 %v5238_v14, %v3004_v56  ;;  %v4551_v58 = vpop.f32.mrb[77].mxu1 }
 0xd77   : > { %v3007_v59 = vpop.f32.mrb[78].mxu1  ;;  %v4068_v58 = vld [vmem:[%s5775_s7 + $0x7] ss:$0 sm:$0xff] }
 0xd78   : > { %v4552_v60 = vpop.f32.mrb[79].mxu1  ;;  %v3148_v61 = vsel %vm1314_vm4, %v3005_v57, -inf }
 0xd79   : > { %3149 = vmax.xlane.f32.xlu0 %v3148_v61  ;;  %v2951_v60 = vadd.f32 %v4068_v58, %v5596_v48 }
 0xd7d   : > { %v3096_v62 = vpop.f32.mrb[80].mxu1 }
 0xd7e   : > { %v3097_v63 = vadd.f32 %v5238_v14, %v3096_v62  ;;  %v4563_v22 = vpop.f32.mrb[81].mxu1 }
 0xd7f   : > { %v3099_v25 = vpop.f32.mrb[82].mxu1 }
 0xd80   : > { %v4564_v0 = vpop.f32.mrb[83].mxu1  ;;  %v3154_v1 = vsel %vm1314_vm4, %v3097_v63, -inf }
 0xd81   : > { %3155 = vmax.xlane.f32.xlu0 %v3154_v1 }
 0xd85   : > { %v3050_v2 = vpop.f32.mrb[76].mxu0 }
 0xd86   : > { %v3051_v3 = vadd.f32 %v5238_v14, %v3050_v2  ;;  %v4557_v4 = vpop.f32.mrb[77].mxu0 }
 0xd87   : > { %v3053_v5 = vpop.f32.mrb[78].mxu0 }
 0xd88   : > { %v4558_v6 = vpop.f32.mrb[79].mxu0  ;;  %v3151_v7 = vsel %vm1314_vm4, %v3051_v3, -inf  ;;  %v4090_v5 = vld [vmem:[%s5776_s8 + $0x14] sm:$0xf] }
 0xd89   : > { %3152 = vmax.xlane.f32.xlu1 %v3151_v7  ;;  %v3443_v6 = vsel %vm1554_vm5, %v4090_v5, 0  ;;  %v4091_v7 = vld [vmem:[%s5776_s8 + $0x18] sm:$0xf] }
 0xd8d   : > { %v3142_v8 = vpop.f32.mrb[80].mxu0 }
 0xd8e   : > { %v3143_v12 = vadd.f32 %v4797_v11, %v3142_v8  ;;  %v4569_v51 = vpop.f32.mrb[81].mxu0 }
 0xd8f   : > { %v3145_v13 = vpop.f32.mrb[82].mxu0  ;;  %v3489_v51 = vsel %vm1554_vm5, %v4091_v7, 0  ;;  %v4734_v7 = vld [vmem:[%s5778_s10 + $0x10] sm:$0xff]  }
 0xd90   : > { %v4570_v15 = vpop.f32.mrb[83].mxu0  ;;  %v3157_v16 = vsel %vm1314_vm4, %v3143_v12, -inf }
 0xd91   : > { %3158 = vmax.xlane.f32.xlu1 %v3157_v16 }
 0xe06   : > { %v3150_v17 = vpop.xlane.xlu0 %3149 }
 0xe07   : > { %v3160_v18 = vsub.f32 %v3005_v57, %v3150_v17 }
 0xe09   : > { %v3164_v19 = vmul.f32 1.442695, %v3160_v18 }
 0xe0b   : > { %4772 = vpow2.f32 %v3164_v19 }
 0xe0e   : > { %v3156_v14 = vpop.xlane.xlu0 %3155 }
 0xe0f   : > { %v3162_v20 = vsub.f32 %v3097_v63, %v3156_v14  ;;  %v3199_v63 = vpack.c.bf16 %v2951_v60, %v2951_v60 }
 0xe11   : > { %v3168_v26 = vmul.f32 1.442695, %v3162_v20  ;;  %v3342_v0 = vsel %vm1554_vm5, %v3199_v63, 0  ;;  %v4092_v20 = vld [vmem:[%s5776_s8 + $0x1c] sm:$0xf] }
 0xe13   : > { %4774 = vpow2.f32 %v3168_v26 }
 0xe15   : > { %v4773_v27 = vpop.eup %4772 }
 0xe16   : > { %v3153_v29 = vpop.xlane.xlu1 %3152  ;;  %v3172_v30 = vsel %vm1314_vm4, %v4773_v27, 0.0 }
 0xe17   : > { %v3161_v31 = vsub.f32 %v3051_v3, %v3153_v29  ;;  %3173 = vadd.xlane.f32.xlu0 %v3172_v30  ;;  %v4089_v3 = vld [vmem:[%s5776_s8 + $0x10] sm:$0xf]  ;;  %v3535_v30 = vsel %vm1554_vm5, %v4092_v20, 0 }
 0xe18   : > { %v3397_v4 = vsel %vm1554_vm5, %v4089_v3, 0 }
 0xe19   : > { %v3166_v34 = vmul.f32 1.442695, %v3161_v31 }
 0xe1b   : > { %4776 = vpow2.f32 %v3166_v34 }
 0xe1d   : > { %v4775_v35 = vpop.eup %4774 }
 0xe1e   : > { %v3159_v36 = vpop.xlane.xlu1 %3158  ;;  %v3178_v37 = vsel %vm1314_vm4, %v4775_v35, 0.0 }
 0xe1f   : > { %v3163_v32 = vsub.f32 %v3143_v12, %v3159_v36  ;;  %3179 = vadd.xlane.f32.xlu0 %v3178_v37 }
 0xe21   : > { %v3170_v38 = vmul.f32 1.442695, %v3163_v32 }
 0xe23   : > { %4778 = vpow2.f32 %v3170_v38 }
 0xe25   : > { %v4777_v39 = vpop.eup %4776 }
 0xe26   : > { %v3175_v40 = vsel %vm1314_vm4, %v4777_v39, 0.0 }
 0xe27   : > { %3176 = vadd.xlane.f32.xlu1 %v3175_v40 }
 0xe2d   : > { %v4779_v23 = vpop.eup %4778 }
 0xe2e   : > { %v3181_v41 = vsel %vm1314_vm4, %v4779_v23, 0.0 }
 0xe2f   : > { %3182 = vadd.xlane.f32.xlu1 %v3181_v41 }
 0xea4   : > { %v3174_v42 = vpop.xlane.xlu0 %3173 }
 0xea5   : > { %4780 = vrcp.f32 %v3174_v42 }
 0xeac   : > { %v3180_v47 = vpop.xlane.xlu0 %3179 }
 0xead   : > { %4782 = vrcp.f32 %v3180_v47 }
 0xeaf   : > { %v4781_v49 = vpop.eup %4780 }
 0xeb0   : > { %v3188_v52 = vmul.f32 %v4781_v49, %v4773_v27 }
 0xeb2   : > { %v3192_v53 = vpack.c.bf16 %v3188_v52, %v3188_v52 }
 0xeb4   : > { %v3177_v56 = vpop.xlane.xlu1 %3176  ;;  %4574 = vmatmul.mubr.msk.bf16.vlgmr.msra.gmra.mrb[84].mxu1 %vm1314_vm4, %v3192_v53 }
 0xeb5   : > { %4784 = vrcp.f32 %v3177_v56  ;;  %4584 = vmatpush3.bf16.msra.mxu1 %v3296_v55  ;;  %4585 = vmatprep.mubr.msk.bf16.mxu1 %vm4863_vm1, %v4862_v9 }
 0xeb6   : > { %4595 = vmatprep.subr.bf16.mxu1 %v4862_v9 }
 0xeb7   : > { %v4783_v57 = vpop.eup %4782 }
 0xeb8   : > { %v3190_v24 = vmul.f32 %v4783_v57, %v4775_v35 }
 0xeba   : > { %v3194_v59 = vpack.c.bf16 %v3190_v24, %v3190_v24 }
 0xebc   : > { %v3183_v61 = vpop.xlane.xlu1 %3182  ;;  %4586 = vmatmul.mubr.msk.bf16.vlgmr.msra.gmra.mrb[88].mxu1 %vm1314_vm4, %v3194_v59 }
 0xebd   : > { %4786 = vrcp.f32 %v3183_v61  ;;  %4597 = vmatprep.mubr.msk.bf16.mxu1 %vm4863_vm1, %v4862_v9  ;;  %4596 = vmatpush3.bf16.msra.mxu1 %v3397_v4 }
 0xebe   : > { %4607 = vmatprep.subr.bf16.mxu1 %v4862_v9 }
 0xebf   : > { %v4785_v62 = vpop.eup %4784 }
 0xec0   : > { %v3189_v22 = vmul.f32 %v4785_v62, %v4777_v39 }
 0xec2   : > { %v3193_v25 = vpack.c.bf16 %v3189_v22, %v3189_v22 }
 0xec4   : > { %4580 = vmatmul.mubr.msk.bf16.vlgmr.msra.gmra.mrb[84].mxu0 %vm1314_vm4, %v3193_v25  ;;  %v4098_v25 = vld [vmem:[%s5777_s9 + $0x1] ss:$0 sm:$0xff] }
 0xec5   : > { %4590 = vmatpush3.bf16.msra.mxu0 %v3342_v0  ;;  %4591 = vmatprep.mubr.msk.bf16.mxu0 %vm4863_vm1, %v4862_v9 }
 0xec6   : > { %4601 = vmatprep.subr.bf16.mxu0 %v4862_v9 }
 0xec7   : > { %v4787_v48 = vpop.eup %4786 }
 0xec8   : > { %v3191_v1 = vmul.f32 %v4787_v48, %v4779_v23 }
 0xeca   : > { %v3195_v2 = vpack.c.bf16 %v3191_v1, %v3191_v1 }
 0xecc   : > { %4592 = vmatmul.mubr.msk.bf16.vlgmr.msra.gmra.mrb[88].mxu0 %vm1314_vm4, %v3195_v2 }
 0xecd   : > { %4603 = vmatprep.mubr.msk.bf16.mxu0 %vm4863_vm1, %v4862_v9  ;;  %4602 = vmatpush3.bf16.msra.mxu0 %v3443_v6 }
 0xece   : > { %4613 = vmatprep.subr.bf16.mxu0 %v4862_v9 }
 0xf87   : > { %v3240_v8 = vpop.f32.mrb[84].mxu1 }
 0xf88   : > { %v3384_v11 = vpack.c.bf16 %v3240_v8, %v3240_v8  ;;  %v4575_v12 = vpop.f32.mrb[85].mxu1  ;;  %v4736_v8 = vld [vmem:[%s5780_s12 + $0x20] sm:$0xff]  }
 0xf89   : > { %v3243_v13 = vpop.f32.mrb[86].mxu1 }
 0xf8a   : > { %v4576_v15 = vpop.f32.mrb[87].mxu1  ;;  %4598 = vmatmul.mubr.msk.bf16.vlgmr.msra.gmra.mrb[92].mxu1 %vm1314_vm4, %v3384_v11  ;;  %v4737_v11 = vld [vmem:[%s5780_s12 + $0x28] sm:$0xff]  }
 0xf8b   : > { %4608 = vmatpush3.bf16.msra.mxu1 %v3489_v51  ;;  %4609 = vmatprep.mubr.msk.bf16.mxu1 %vm4863_vm1, %v4862_v9 }
 0xf8c   : > { %4619 = vmatprep.subr.bf16.mxu1 %v4862_v9 }
 0xf8f   : > { %v3332_v16 = vpop.f32.mrb[88].mxu1 }
 0xf90   : > { %v3386_v17 = vpack.c.bf16 %v3332_v16, %v3332_v16  ;;  %v4587_v18 = vpop.f32.mrb[89].mxu1 }
 0xf91   : > { %v3335_v19 = vpop.f32.mrb[90].mxu1 }
 0xf92   : > { %v4588_v14 = vpop.f32.mrb[91].mxu1  ;;  %4610 = vmatmul.mubr.msk.bf16.vlgmr.msra.gmra.mrb[96].mxu1 %vm1314_vm4, %v3386_v17 }
 0xf93   : > { %4623 = vmatprep.mubr.msk.bf16.mxu1 %vm4863_vm1, %v4862_v9  ;;  %4620 = vmatpush3.bf16.msra.mxu1 %v4734_v7  ;;  %v3616_v14 = vrot.slane %v5402_v54, %v1965_v44  ;;  %v4739_v44 = vld [vmem:[%s5780_s12 + $0x38] sm:$0xff]  }
 0xf94   : > { %4621 = vmatprep.subr.bf16.mxu1 %v4862_v9 }
 0xf97   : > { %v3286_v26 = vpop.f32.mrb[84].mxu0 }
 0xf98   : > { %v3385_v27 = vpack.c.bf16 %v3286_v26, %v3286_v26  ;;  %v4581_v29 = vpop.f32.mrb[85].mxu0 }
 0xf99   : > { %v3289_v31 = vpop.f32.mrb[86].mxu0 }
 0xf9a   : > { %v4582_v34 = vpop.f32.mrb[87].mxu0  ;;  %4604 = vmatmul.mubr.msk.bf16.vlgmr.msra.gmra.mrb[92].mxu0 %vm1314_vm4, %v3385_v27  ;;  %v3622_v27 = vrot.slane %v5402_v54, %v1971_v46  ;;  %v4104_v46 = vld [vmem:[%s5779_s11 + $0x1] ss:$0 sm:$0xff] }
 0xf9b   : > { %4614 = vmatpush3.bf16.msra.mxu0 %v3535_v30  ;;  %4615 = vmatprep.mubr.msk.bf16.mxu0 %vm4863_vm1, %v4862_v9  ;;  %v4738_v34 = vld [vmem:[%s5780_s12 + $0x30] sm:$0xff]  }
 0xf9c   : > { %4627 = vmatprep.subr.bf16.mxu0 %v4862_v9 }
 0xf9f   : > { %v3378_v35 = vpop.f32.mrb[88].mxu0 }
 0xfa0   : > { %v3387_v36 = vpack.c.bf16 %v3378_v35, %v3378_v35  ;;  %v4593_v37 = vpop.f32.mrb[89].mxu0 }
 0xfa1   : > { %v3381_v32 = vpop.f32.mrb[90].mxu0 }
 0xfa2   : > { %v4594_v38 = vpop.f32.mrb[91].mxu0  ;;  %4616 = vmatmul.mubr.msk.bf16.vlgmr.msra.gmra.mrb[96].mxu0 %vm1314_vm4, %v3387_v36 }
 0xfa3   : > { %4635 = vmatprep.mubr.msk.bf16.mxu0 %vm4863_vm1, %v4862_v9  ;;  %4628 = vmatpush3.bf16.msra.mxu0 %v4736_v8 }
 0xfa4   : > { %4629 = vmatprep.subr.bf16.mxu0 %v4862_v9 }
 0xfa7   : > { %4630 = vmatpush3.bf16.msra.mxu0 %v4737_v11 }
 0xfa8   : > { %4631 = vmatprep.subr.bf16.mxu0 %v4862_v9 }
 0xfab   : > { %4632 = vmatpush3.bf16.msra.mxu0 %v4738_v34 }
 0xfac   : > { %4633 = vmatprep.subr.bf16.mxu0 %v4862_v9  ;;  %v4122_v9 = vld [vmem:[%s5781_s13 + $0x1] ss:$0 sm:$0xff] }
 0xfaf   : > { %4634 = vmatpush3.bf16.msra.mxu0 %v4739_v44 }
0x105d   : > { %v3433_v39 = vpop.f32.mrb[92].mxu1 }
0x105e   : > { %v4599_v40 = vpop.f32.mrb[93].mxu1  ;;  %v3577_v50 = vsel %vm508_vm0, %v3433_v39, 0.0 }
0x105f   : > { %v3436_v23 = vpop.f32.mrb[94].mxu1 }
0x1060   : > { %v4600_v41 = vpop.f32.mrb[95].mxu1 }
0x1065   : > { %v3525_v42 = vpop.f32.mrb[96].mxu1 }
0x1066   : > { %v4611_v43 = vpop.f32.mrb[97].mxu1  ;;  %v3580_v57 = vsel %vm508_vm0, %v3525_v42, 0.0 }
0x1067   : > { %v3528_v45 = vpop.f32.mrb[98].mxu1 }
0x1068   : > { %v4612_v47 = vpop.f32.mrb[99].mxu1 }
0x106d   : > { %v3479_v49 = vpop.f32.mrb[92].mxu0 }
0x106e   : > { %v3578_v52 = vsel %vm508_vm0, %v3479_v49, 0.0  ;;  %v4605_v53 = vpop.f32.mrb[93].mxu0 }
0x106f   : > { %v3579_v55 = vadd.f32 %v3578_v52, %v3577_v50  ;;  %v3482_v56 = vpop.f32.mrb[94].mxu0 }
0x1070   : > { %v4606_v24 = vpop.f32.mrb[95].mxu0 }
0x1071   : > { %v3581_v58 = vadd.f32 %v3580_v57, %v3579_v55 }
0x1075   : > { %v3571_v59 = vpop.f32.mrb[96].mxu0 }
0x1076   : > { %v3582_v60 = vsel %vm508_vm0, %v3571_v59, 0.0  ;;  %v4617_v61 = vpop.f32.mrb[97].mxu0 }
0x1077   : > { %v3583_v62 = vadd.f32 %v3582_v60, %v3581_v58  ;;  %v3574_v63 = vpop.f32.mrb[98].mxu0 }
0x1078   : > { %v4618_v22 = vpop.f32.mrb[99].mxu0 }
0x1079   : > { %v3584_v0 = vadd.f32 %v3583_v62, %v5377_v33  ;;  %v4735_v33 = vld [vmem:[%s5778_s10 + $0x18] sm:$0xff]   ;;  %v3803_v22 = vrot.slane %v5402_v54, %v2149_v10 }
0x107a   : > { %4622 = vmatpush3.bf16.msra.mxu1 %v4735_v33 }
0x107b   : > { %v3593_v48 = vadd.f32 %v4098_v25, %v3584_v0 }
0x107d   : > { %v3594_v1 = vsel %vm508_vm0, %v3593_v48, 0.0 }
0x107e   : > { %3595 = vadd.xlane.f32.xlu0 %v3594_v1 }
0x110b   : > { %v3596_v2 = vpop.xlane.xlu0 %3595 }
0x110c   : > { %v3597_v3 = vmul.f32 0.03125, %v3596_v2 }
0x110e   : > { %v3598_v4 = vsub.f32 %v3593_v48, %v3597_v3 }
0x1110   : > { %v3599_v5 = vmul.f32 %v3598_v4, %v3598_v4 }
0x1112   : > { %v3600_v6 = vsel %vm508_vm0, %v3599_v5, 0.0 }
0x1113   : > { %3601 = vadd.xlane.f32.xlu1 %v3600_v6 }
0x11a0   : > { %v3602_v12 = vpop.xlane.xlu1 %3601 }
0x11a1   : > { %v3603_v51 = vmul.f32 0.032258064, %v3602_v12 }
0x11a3   : > { %4788 = vrsqrt.f32 %v3603_v51  ;;  %vm3606_vm13 = vcmp.eq.f32.partialorder %v3603_v51, inf  ;;  %v3609_v16 = vand.u32 2147483648, %v3603_v51  ;;  %vm3608_vm14 = vcmp.eq.f32.partialorder %v3603_v51, 0.0 }
0x11ad   : > { %v4789_v13 = vpop.eup %4788 }
0x11ae   : > { %v3605_v15 = vmul.f32 %v4789_v13, %v3603_v51 }
0x11b0   : > { %v3607_v17 = vsel %vm3606_vm13, %v3603_v51, %v3605_v15 }
0x11b1   : > { %v3610_v18 = vsel %vm3608_vm14, %v3609_v16, %v3607_v17 }
0x11b2   : > { %v3611_v19 = vadd.f32 1e-06, %v3610_v18 }
0x11b4   : > { %4790 = vrcp.f32 %v3611_v19 }
0x11be   : > { %v4791_v20 = vpop.eup %4790 }
0x11bf   : > { %v3617_v26 = vmul.f32 %v4791_v20, %v3616_v14 }
0x11c1   : > { %v3618_v29 = vmul.f32 %v3617_v26, %v3598_v4 }
0x11c3   : > { %v3623_v30 = vadd.f32 %v3622_v27, %v3618_v29 }
0x11c5   : > { %v3624_v31 = vpack.c.bf16 %v3623_v30, %v3623_v30 }
0x11c7   : > { %4624 = vmatmul.mubr.msk.bf16.vlgmr.msra.gmra.mrb[100].mxu1 %vm508_vm0, %v3624_v31 }
0x129a   : > { %v3687_v35 = vpop.f32.mrb[100].mxu1 }
0x129b   : > { %v3688_v36 = vadd.f32 %v4104_v46, %v3687_v35  ;;  %v4625_v37 = vpop.f32.mrb[101].mxu1 }
0x129c   : > { %v3690_v32 = vpop.f32.mrb[102].mxu1 }
0x129d   : > { %v3693_v38 = vmax.f32 %v3688_v36, 0.0  ;;  %v4626_v39 = vpop.f32.mrb[103].mxu1 }
0x129f   : > { %v3694_v40 = vpack.c.bf16 %v3693_v38, %v3693_v38 }
0x12a1   : > { %4636 = vmatmul.mubr.msk.bf16.vlgmr.msra.gmra.mrb[100].mxu0 %vm2075_vm8, %v3694_v40 }
0x1374   : > { %v3765_v23 = vpop.f32.mrb[100].mxu0 }
0x1375   : > { %v3771_v41 = vadd.f32 %v3765_v23, %v3593_v48  ;;  %v4637_v42 = vpop.f32.mrb[101].mxu0  ;;  %v3809_v48 = vrot.slane %v5402_v54, %v2155_v28 }
0x1376   : > { %v3768_v43 = vpop.f32.mrb[102].mxu0 }
0x1377   : > { %v4638_v45 = vpop.f32.mrb[103].mxu0  ;;  %v3780_v47 = vadd.f32 %v4122_v9, %v3771_v41 }
0x1379   : > { %v3781_v49 = vsel %vm508_vm0, %v3780_v47, 0.0 }
0x137a   : > { %3782 = vadd.xlane.f32.xlu0 %v3781_v49 }
0x1407   : > { %v3783_v50 = vpop.xlane.xlu0 %3782 }
0x1408   : > { %v3784_v52 = vmul.f32 0.03125, %v3783_v50 }
0x140a   : > { %v3785_v53 = vsub.f32 %v3780_v47, %v3784_v52 }
0x140c   : > { %v3786_v55 = vmul.f32 %v3785_v53, %v3785_v53 }
0x140e   : > { %v3787_v56 = vsel %vm508_vm0, %v3786_v55, 0.0 }
0x140f   : > { %3788 = vadd.xlane.f32.xlu1 %v3787_v56 }
0x149c   : > { %v3789_v57 = vpop.xlane.xlu1 %3788 }
0x149d   : > { %v3790_v24 = vmul.f32 0.032258064, %v3789_v57 }
0x149f   : > { %4792 = vrsqrt.f32 %v3790_v24  ;;  %vm3793_vm15 = vcmp.eq.f32.partialorder %v3790_v24, inf  ;;  %v3796_v60 = vand.u32 2147483648, %v3790_v24  ;;  %vm3795_vm1 = vcmp.eq.f32.partialorder %v3790_v24, 0.0 }
0x14a9   : > { %v4793_v58 = vpop.eup %4792 }
0x14aa   : > { %v3792_v59 = vmul.f32 %v4793_v58, %v3790_v24 }
0x14ac   : > { %v3794_v61 = vsel %vm3793_vm15, %v3790_v24, %v3792_v59 }
0x14ad   : > { %v3797_v62 = vsel %vm3795_vm1, %v3796_v60, %v3794_v61 }
0x14ae   : > { %v3798_v63 = vadd.f32 1e-06, %v3797_v62 }
0x14b0   : > { %4794 = vrcp.f32 %v3798_v63 }
0x14ba   : > { %v4795_v25 = vpop.eup %4794 }
0x14bb   : > { %v3804_v0 = vmul.f32 %v4795_v25, %v3803_v22 }
0x14bd   : > { %v3805_v1 = vmul.f32 %v3804_v0, %v3785_v53 }
0x14bf   : > { %v3810_v2 = vadd.f32 %v3809_v48, %v3805_v1 }
0x14c1   : > { %3811 = vst.msk [vmem:[%s496_s25] sm:$0xff] %vm508_vm0, %v3810_v2 }
0x14c2   : > { %4811 = shalt.err (!%p4808_p3)
}
0x14c3   : > { %s4812_s0 = scalar_lea.hbm %s5725_s30, 128  ;;  %s4816_s23 = scalar_lea.hbm %s5783_s15, 256 }
0x14c4   : > { %p4813_p4 = scmp.ne.s32.totalorder %s5725_s30, %s4812_s0  ;;  %p4817_p9 = scmp.lt.u32.totalorder %s5725_s30, %s5783_s15 }
0x14c5   : > { %p4818_p10 = scmp.lt.u32.totalorder %s4816_s23, %s4812_s0  ;;  %p4820_p12 = scmp.lt.u32.totalorder %s4812_s0, %s5725_s30 }
0x14c6   : > { %p4814_p7 = pnand %p4813_p4, %p4983_p5 }
0x14c7   : > { %p4819_p11 = por %p4818_p10, %p4817_p9 }
0x14c8   : > { %p4815_p8 = pneg %p4814_p7 }
0x14c9   : > { %p4821_p13 = por %p4820_p12, %p4819_p11 }
0x14cb   : > { %p4822_p0 = pnand %p4821_p13, %p4815_p8 }
0x14cd   : > { %4825 = shalt.err (!%p4822_p0)
}
0x14ce   : > { %4639 = dma.vmem_to_hbm [thread:$0]  (%p4983_p5), %s5727_s16, 128, %s5725_s30, %s3813_s26  }
0x14cf PF: > { %p4645_p1 = scmp.ge.s32.totalorder %s4860_s21, 2  ;;  %s3838_s1 = sand.u32 1, %s4848_s18  }
0x14d0   : > { %s3839_s2 = scalar_lea.sflag [#allocation3], %s3838_s1 }
0x14d1   : > { %p4642_p2 = pnand %p4645_p1, %p4987_p6 }
0x14d3   : > { %4843 = dma.done.wait (!%p4642_p2), %s3839_s2, 128  }
0x14d4   : > { %4845 = vsyncadd (!%p4642_p2), %s3839_s2, 4294967168  ;;  %s5795_s20 = sld [smem:[#allocation5_spill]]  ;;  %s5796_s0 = sld [smem:[#allocation6_spill]] }
0x14d5   : > { %p25_p3 = scmp.ge.s32.totalorder %s4970_s24, 4   ;;  %s5797_s18 = smov %s4852_s19 }
0x14d6   : > { %s5800_s21 = smov %s4970_s24 }
0x14d7   :  { %27 = sbr.rel (!%p25_p3) target bundleno = 7 (0x7), region = 131 }
0x14da   : > { %s5798_s19 = smov %s5795_s20  ;;  %s5799_s20 = smov %s5796_s0 }
0x14de   :  { %3844 = vsyncpa [#allocation3], 1 }
0x14df   :  { %3846 = vsyncpa [#allocation3 + $0x1], 1 }

</bundles_post_ra>
